<compile_context>
chip_gen: v5e
topology: v5e:2x2
jax: 0.10.0
libtpu: 0.0.40
codegen_flags: <defaults>
</compile_context>

<pallas_src>
import functools

import jax
import jax.numpy as jnp
from jax.experimental import pallas as pl
from jax.experimental.pallas import tpu as pltpu

KERNEL_SIZE = 31
PAD = 15          # conv1d padding
HALO = 16         # PAD rounded up to a sublane multiple for aligned stores
LN_EPS = 1e-5


def _conv_module_kernel(x_ref, ln_g_ref, ln_b_ref, w1_ref, wdw_ref,
                        bn_scale_ref, bn_shift_ref, w2_ref, out_ref,
                        win_ref, h_ref, *, l_real, mask_tail):
    """Grid = (B, num_l_tiles + 1); output for L-tile j is written at step j+1.

    win_ref: persistent VMEM scratch (HALO + TL + HALO, D) laid out as
        rows [0, HALO)            : tail of h for tile j-1   (zeros at j == 0)
        rows [HALO, HALO+TL)      : h for tile j
        rows [HALO+TL, TL+2*HALO) : head of h for tile j+1   (zeros at last tile)
    h_ref: (TL, D) scratch that carries the current tile's h from the gated
        compute block to the post-FIR window store.
    """
    i = pl.program_id(1)
    n_flush = pl.num_programs(1) - 1            # number of real L tiles
    tl, d = x_ref.shape[1], x_ref.shape[2]
    fir_dtype = win_ref.dtype

    # ---- LayerNorm + fused pointwise conv1 ((D,2D) matmul) + GLU -----------
    # Only on real tiles (review opt 1: no wasted tile on the flush step).
    @pl.when(i < n_flush)
    def _compute_h():
        x = x_ref[0].astype(jnp.float32)                     # (TL, D)
        mu = jnp.mean(x, axis=-1, keepdims=True)
        var = jnp.mean((x - mu) ** 2, axis=-1, keepdims=True)
        xn = (x - mu) * jax.lax.rsqrt(var + LN_EPS)
        xn = xn * ln_g_ref[...] + ln_b_ref[...]
        ag = jnp.dot(xn.astype(jnp.bfloat16), w1_ref[...],
                     preferred_element_type=jnp.float32)     # (TL, 2D)
        h = ag[:, :d] * jax.nn.sigmoid(ag[:, d:])            # GLU, (TL, D) f32
        if mask_tail:
            # Zero h on rows that only exist because L was padded up, so the
            # depthwise FIR sees zero padding exactly like the reference.
            rows = i * tl + jax.lax.broadcasted_iota(jnp.int32, (tl, 1), 0)
            h = jnp.where(rows < l_real, h, 0.0)
        h = h.astype(fir_dtype)
        h_ref[...] = h
        # Future halo for the previous tile's FIR = head of this tile's h.
        win_ref[tl + HALO:tl + 2 * HALO, :] = h[:HALO, :]

    @pl.when(i == n_flush)
    def _zero_future_halo():                    # last tile: padding beyond L
        win_ref[tl + HALO:tl + 2 * HALO, :] = jnp.zeros((HALO, d), fir_dtype)

    @pl.when(i == 0)
    def _zero_past_halo():                      # first tile: padding before 0
        win_ref[:HALO, :] = jnp.zeros((HALO, d), fir_dtype)

    # ---- produce output for tile j = i - 1 (reads win_ref only) ------------
    @pl.when(i > 0)
    def _produce():
        # Depthwise 31-tap FIR along L; taps loaded once (hoisted).
        w_all = wdw_ref[...]                                  # (31, D)
        acc = jnp.zeros((tl, d), jnp.float32)                 # f32 accumulator
        for k in range(KERNEL_SIZE):                          # static unroll
            acc = acc + (win_ref[(HALO - PAD) + k:(HALO - PAD) + k + tl, :]
                         * w_all[k:k + 1, :])
        # Folded BatchNorm (eval) + SiLU + pointwise conv2.
        y = acc * bn_scale_ref[...] + bn_shift_ref[...]
        y = y * jax.nn.sigmoid(y)
        out = jnp.dot(y.astype(jnp.bfloat16), w2_ref[...],
                      preferred_element_type=jnp.float32)
        out_ref[0] = out.astype(out_ref.dtype)

    # ---- update the carried window for the next step (after the FIR reads) --
    @pl.when(jnp.logical_and(i > 0, i < n_flush))
    def _carry_past_halo():
        # Tail of the previous tile's h (still in the middle region).
        win_ref[:HALO, :] = win_ref[tl:tl + HALO, :]

    @pl.when(i < n_flush)
    def _store_h():
        win_ref[HALO:HALO + tl, :] = h_ref[...]


def _round_up(x, m):
    return (x + m - 1) // m * m


def _pick_block_l(L, D):
    """D-aware L-tile size; always a multiple of 16 and >= HALO."""
    cands = (512, 256, 128, 64, 32, 16) if D <= 512 else (256, 128, 64, 32, 16)
    for c in cands:                         # prefer an exact divisor of L
        if L >= c and L % c == 0:
            return c
    thr = max(L // 8, 16)                   # else bound the padding waste
    for c in cands:
        if c <= L and _round_up(L, c) - L <= thr:
            return c
    return 16


def convolution_module(x, params, *, block_l=None, fir_dtype=jnp.float32):
    """x: (B, L, D) float32.  params: dict of arrays (see make_params).

    fir_dtype: dtype of the depthwise-conv window scratch / taps.  Pass
    jnp.bfloat16 on v6e/v7x to halve FIR load bytes (f32 accumulation is kept);
    keep the default f32 on v5e.
    """
    B, L, D = x.shape
    if block_l is None:
        block_l = _pick_block_l(L, D)
    assert block_l % 16 == 0 and block_l >= HALO, "block_l must be a multiple of 16 and >= 16"
    # NOTE: for peak throughput D should be a multiple of 128 (lane width).

    L_pad = _round_up(L, block_l)
    n_l = L_pad // block_l
    mask_tail = (L_pad != L)
    if mask_tail:
        x = jnp.pad(x, ((0, 0), (0, L_pad - L), (0, 0)))

    wdw = params["wdw"].astype(fir_dtype)
    fir_bytes = jnp.dtype(fir_dtype).itemsize

    wmap = lambda b, i: (0, 0)
    in_specs = [
        # x: L-tiled; index clamped at the flush step (no re-DMA, not read).
        pl.BlockSpec((1, block_l, D),
                     lambda b, i: (b, jnp.minimum(i, n_l - 1), 0)),
        pl.BlockSpec((1, D), wmap),              # LayerNorm gamma
        pl.BlockSpec((1, D), wmap),              # LayerNorm beta
        pl.BlockSpec((D, 2 * D), wmap),          # fused pointwise conv1 (bf16)
        pl.BlockSpec((KERNEL_SIZE, D), wmap),    # depthwise taps
        pl.BlockSpec((1, D), wmap),              # folded BN scale
        pl.BlockSpec((1, D), wmap),              # folded BN shift
        pl.BlockSpec((D, D), wmap),              # pointwise conv2 (bf16)
    ]

    # ---- VMEM budget: actual requirement + slack, capped for v7x ------------
    weight_bytes = (D * 2 * D) * 2 + (D * D) * 2 + KERNEL_SIZE * D * fir_bytes + 4 * D * 4
    need = (4 * block_l * D * 4                         # x + out double buffers
            + 2 * weight_bytes                          # weights (double-buffered)
            + (block_l + 2 * HALO) * D * fir_bytes      # window scratch
            + block_l * D * fir_bytes)                  # h scratch
    vmem_limit = int(max(min(2 * need, 48 * 1024 * 1024), need + 8 * 1024 * 1024))

    flops = 2 * B * L_pad * D * (3 * D) + 2 * B * L_pad * D * KERNEL_SIZE
    transcendentals = 2 * B * L_pad * D                 # GLU sigmoid + SiLU
    bytes_accessed = (2 * B * L_pad * D) * 4 + 3 * D * D * 2 + (KERNEL_SIZE + 4) * D * 4

    kernel = functools.partial(_conv_module_kernel, l_real=L, mask_tail=mask_tail)

    out = pl.pallas_call(
        kernel,
        out_shape=jax.ShapeDtypeStruct((B, L_pad, D), x.dtype),
        grid_spec=pltpu.PrefetchScalarGridSpec(
            num_scalar_prefetch=0,
            grid=(B, n_l + 1),                  # +1 flush step for the skew
            in_specs=in_specs,
            out_specs=pl.BlockSpec((1, block_l, D),
                                   lambda b, i: (b, jnp.maximum(i - 1, 0), 0)),
            scratch_shapes=[pltpu.VMEM((block_l + 2 * HALO, D), fir_dtype),
                            pltpu.VMEM((block_l, D), fir_dtype)],
        ),
        compiler_params=pltpu.CompilerParams(
            dimension_semantics=("parallel", "arbitrary"),
            vmem_limit_bytes=vmem_limit),
        cost_estimate=pl.CostEstimate(flops=flops,
                                      transcendentals=transcendentals,
                                      bytes_accessed=bytes_accessed),
    )(x, params["ln_g"], params["ln_b"], params["w1"], wdw,
      params["bn_scale"], params["bn_shift"], params["w2"])

    if mask_tail:
        out = out[:, :L, :]
    return out


def make_params(key, D):
    """Deterministic parameters matching the PyTorch module's shapes."""
    k1, k2, k3, k4, k5 = jax.random.split(key, 5)
    # nn.Conv1d weights: (out_ch, in_ch, kernel)
    w_pw1 = jax.random.normal(k1, (2 * D, D, 1), jnp.float32) * 0.1
    w_dw = jax.random.normal(k2, (D, 1, KERNEL_SIZE), jnp.float32) * 0.1
    w_pw2 = jax.random.normal(k3, (D, D, 1), jnp.float32) * 0.1
    ln_g = 1.0 + 0.1 * jax.random.normal(k4, (D,), jnp.float32)
    ln_b = 0.05 * jax.random.normal(k5, (D,), jnp.float32)
    # BatchNorm1d (eval): running_mean=0, running_var=1, weight=1, bias=0
    bn_gamma = jnp.ones((D,), jnp.float32)
    bn_beta = jnp.zeros((D,), jnp.float32)
    bn_mean = jnp.zeros((D,), jnp.float32)
    bn_var = jnp.ones((D,), jnp.float32)
    bn_eps = 1e-5
    bn_scale = bn_gamma / jnp.sqrt(bn_var + bn_eps)
    bn_shift = bn_beta - bn_mean * bn_scale
    return {
        "ln_g": ln_g.reshape(1, D),
        "ln_b": ln_b.reshape(1, D),
        # fused channels-last pointwise-conv1 weight: value half then gate half
        "w1": w_pw1[:, :, 0].T.astype(jnp.bfloat16),        # (D, 2D)
        "wdw": w_dw[:, 0, :].T,                             # (31, D) f32
        "bn_scale": bn_scale.reshape(1, D),
        "bn_shift": bn_shift.reshape(1, D),
        "w2": w_pw2[:, :, 0].T.astype(jnp.bfloat16),        # (D, D)
    }


def reference(x, p):
    """Pure-JAX f32 reference of the same eval-mode forward pass."""
    D = x.shape[-1]
    L = x.shape[1]
    mu = jnp.mean(x, axis=-1, keepdims=True)
    var = jnp.mean((x - mu) ** 2, axis=-1, keepdims=True)
    xn = (x - mu) / jnp.sqrt(var + LN_EPS) * p["ln_g"][0] + p["ln_b"][0]
    ag = xn @ p["w1"].astype(jnp.float32)
    h = ag[..., :D] * jax.nn.sigmoid(ag[..., D:])
    hp = jnp.pad(h, ((0, 0), (PAD, PAD), (0, 0)))
    acc = jnp.zeros_like(h)
    for k in range(KERNEL_SIZE):
        acc = acc + hp[:, k:k + L, :] * p["wdw"][k][None, None, :]
    y = acc * p["bn_scale"][0] + p["bn_shift"][0]
    y = y * jax.nn.sigmoid(y)
    return y @ p["w2"].astype(jnp.float32)


if __name__ == "__main__":
    # Small demo shapes.  L=72 is deliberately NOT a multiple of block_l=32 so
    # the pad-and-mask tail path is exercised; block_l=32 with n_l=3 exercises
    # the halo-carry, skewed-output, and gated-flush paths.
    B, L, D = 2, 72, 32
    key = jax.random.PRNGKey(0)
    kx, kp = jax.random.split(key)
    x = jax.random.normal(kx, (B, L, D), jnp.float32)
    params = make_params(kp, D)

    out = jax.block_until_ready(convolution_module(x, params, block_l=32))
    ref = reference(x, params)

    assert out.shape == (B, L, D)
    max_ref = float(jnp.max(jnp.abs(ref)))
    max_err = float(jnp.max(jnp.abs(out - ref)))
    # bf16 MXU operands (f32 accumulation) => compare at bf16-level tolerance.
    assert max_err <= 2e-2 * max_ref + 1e-5, (max_err, max_ref)
    print("KERNEL_OK")
</pallas_src>

<mosaic_0001>
module attributes {stable_mosaic.version = 11 : i64} {
  func.func @_conv_module_kernel(%arg0: i32, %arg1: i32, %arg2: memref<1x32x32xf32, #tpu.memory_space<vmem>>, %arg3: memref<1x32xf32, #tpu.memory_space<vmem>>, %arg4: memref<1x32xf32, #tpu.memory_space<vmem>>, %arg5: memref<32x64xbf16, #tpu.memory_space<vmem>>, %arg6: memref<31x32xf32, #tpu.memory_space<vmem>>, %arg7: memref<1x32xf32, #tpu.memory_space<vmem>>, %arg8: memref<1x32xf32, #tpu.memory_space<vmem>>, %arg9: memref<32x32xbf16, #tpu.memory_space<vmem>>, %arg10: memref<1x32x32xf32, #tpu.memory_space<vmem>>, %arg11: memref<64x32xf32, #tpu.memory_space<vmem>>, %arg12: memref<32x32xf32, #tpu.memory_space<vmem>>) attributes {dimension_semantics = [#tpu.dimension_semantics<parallel>, #tpu.dimension_semantics<arbitrary>], iteration_bounds = array<i64: 2, 4>, scalar_prefetch = 0 : i64, scratch_operands = 2 : i64, tpu.core_type = #tpu.core_type<tc>, window_params = [{transform_indices = @transform_0, window_bounds = array<i64: 1, 32, 32>}, {pipeline_mode = #tpu.pipeline_mode<synchronous>, transform_indices = @transform_1, window_bounds = array<i64: 1, 32>}, {pipeline_mode = #tpu.pipeline_mode<synchronous>, transform_indices = @transform_2, window_bounds = array<i64: 1, 32>}, {pipeline_mode = #tpu.pipeline_mode<synchronous>, transform_indices = @transform_3, window_bounds = array<i64: 32, 64>}, {pipeline_mode = #tpu.pipeline_mode<synchronous>, transform_indices = @transform_4, window_bounds = array<i64: 31, 32>}, {pipeline_mode = #tpu.pipeline_mode<synchronous>, transform_indices = @transform_5, window_bounds = array<i64: 1, 32>}, {pipeline_mode = #tpu.pipeline_mode<synchronous>, transform_indices = @transform_6, window_bounds = array<i64: 1, 32>}, {pipeline_mode = #tpu.pipeline_mode<synchronous>, transform_indices = @transform_7, window_bounds = array<i64: 32, 32>}, {transform_indices = @transform_8, window_bounds = array<i64: 1, 32, 32>}]} {
    %c3_i32 = arith.constant 3 : i32
    %0 = arith.cmpi slt, %arg1, %c3_i32 : i32
    %1 = arith.extui %0 : i1 to i32
    %c0_i32 = arith.constant 0 : i32
    %2 = arith.cmpi ne, %1, %c0_i32 : i32
    scf.if %2 {
      %c0 = arith.constant 0 : index
      %c0_11 = arith.constant 0 : index
      %c0_12 = arith.constant 0 : index
      %20 = vector.load %arg2[%c0, %c0_11, %c0_12] : memref<1x32x32xf32, #tpu.memory_space<vmem>>, vector<1x32x32xf32>
      %21 = vector.shape_cast %20 : vector<1x32x32xf32> to vector<32x32xf32>
      %cst = arith.constant dense<0.000000e+00> : vector<32xf32>
      %22 = vector.multi_reduction <add>, %21, %cst [1] : vector<32x32xf32> to vector<32xf32>
      %23 = vector.shape_cast %22 : vector<32xf32> to vector<32x1xf32>
      %cst_13 = arith.constant 3.200000e+01 : f32
      %24 = vector.broadcast %cst_13 : f32 to vector<32x1xf32>
      %25 = arith.divf %23, %24 : vector<32x1xf32>
      %26 = vector.broadcast %25 : vector<32x1xf32> to vector<32x32xf32>
      %27 = arith.subf %21, %26 : vector<32x32xf32>
      %28 = arith.mulf %27, %27 : vector<32x32xf32>
      %cst_14 = arith.constant dense<0.000000e+00> : vector<32xf32>
      %29 = vector.multi_reduction <add>, %28, %cst_14 [1] : vector<32x32xf32> to vector<32xf32>
      %30 = vector.shape_cast %29 : vector<32xf32> to vector<32x1xf32>
      %cst_15 = arith.constant 3.200000e+01 : f32
      %31 = vector.broadcast %cst_15 : f32 to vector<32x1xf32>
      %32 = arith.divf %30, %31 : vector<32x1xf32>
      %33 = vector.broadcast %25 : vector<32x1xf32> to vector<32x32xf32>
      %34 = arith.subf %21, %33 : vector<32x32xf32>
      %cst_16 = arith.constant 9.99999974E-6 : f32
      %35 = vector.broadcast %cst_16 : f32 to vector<32x1xf32>
      %36 = arith.addf %32, %35 : vector<32x1xf32>
      %37 = math.rsqrt %36 : vector<32x1xf32>
      %38 = vector.broadcast %37 : vector<32x1xf32> to vector<32x32xf32>
      %39 = arith.mulf %34, %38 : vector<32x32xf32>
      %c0_17 = arith.constant 0 : index
      %c0_18 = arith.constant 0 : index
      %40 = vector.load %arg3[%c0_17, %c0_18] : memref<1x32xf32, #tpu.memory_space<vmem>>, vector<1x32xf32>
      %41 = vector.broadcast %40 : vector<1x32xf32> to vector<32x32xf32>
      %42 = arith.mulf %39, %41 : vector<32x32xf32>
      %c0_19 = arith.constant 0 : index
      %c0_20 = arith.constant 0 : index
      %43 = vector.load %arg4[%c0_19, %c0_20] : memref<1x32xf32, #tpu.memory_space<vmem>>, vector<1x32xf32>
      %44 = vector.broadcast %43 : vector<1x32xf32> to vector<32x32xf32>
      %45 = arith.addf %42, %44 : vector<32x32xf32>
      %46 = arith.truncf %45 : vector<32x32xf32> to vector<32x32xbf16>
      %c0_21 = arith.constant 0 : index
      %c0_22 = arith.constant 0 : index
      %47 = vector.load %arg5[%c0_21, %c0_22] : memref<32x64xbf16, #tpu.memory_space<vmem>>, vector<32x64xbf16>
      %cst_23 = arith.constant dense<0.000000e+00> : vector<32x64xf32>
      %48 = tpu.matmul %46, %47, %cst_23 {dimension_numbers = #tpu.dot_dimension_numbers<[1], [0], [0], [1], [0, 0, 1, 1], [], []>} : vector<32x32xbf16>, vector<32x64xbf16>, vector<32x64xf32> -> vector<32x64xf32>
      %49 = vector.extract_strided_slice %48 {offsets = [0, 0], sizes = [32, 32], strides = [1, 1]} : vector<32x64xf32> to vector<32x32xf32>
      %50 = vector.extract_strided_slice %48 {offsets = [0, 32], sizes = [32, 32], strides = [1, 1]} : vector<32x64xf32> to vector<32x32xf32>
      %51 = arith.negf %50 : vector<32x32xf32>
      %52 = math.exp %51 : vector<32x32xf32>
      %cst_24 = arith.constant 1.000000e+00 : f32
      %53 = vector.broadcast %cst_24 : f32 to vector<32x32xf32>
      %54 = arith.addf %53, %52 : vector<32x32xf32>
      %55 = arith.divf %53, %54 : vector<32x32xf32>
      %56 = arith.mulf %49, %55 : vector<32x32xf32>
      %c32_i32 = arith.constant 32 : i32
      %57 = arith.muli %arg1, %c32_i32 : i32
      %58 = tpu.iota {dimensions = array<i32: 0>} : vector<32x1xi32>
      %59 = vector.broadcast %57 : i32 to vector<32x1xi32>
      %60 = arith.addi %59, %58 : vector<32x1xi32>
      %c72_i32 = arith.constant 72 : i32
      %61 = vector.broadcast %c72_i32 : i32 to vector<32x1xi32>
      %62 = arith.cmpi slt, %60, %61 : vector<32x1xi32>
      %cst_25 = arith.constant 0.000000e+00 : f32
      %63 = vector.shape_cast %62 : vector<32x1xi1> to vector<32x1xi1>
      %64 = vector.broadcast %63 : vector<32x1xi1> to vector<32x32xi1>
      %65 = vector.broadcast %cst_25 : f32 to vector<32x32xf32>
      %66 = arith.select %64, %56, %65 : vector<32x32xi1>, vector<32x32xf32>
      %c0_26 = arith.constant 0 : index
      %c0_27 = arith.constant 0 : index
      %67 = vector.load %arg12[%c0_26, %c0_27] : memref<32x32xf32, #tpu.memory_space<vmem>>, vector<32x32xf32>
      tpu.vector_store %arg12[%c0_26, %c0_27], %66 {strides = array<i32>} : memref<32x32xf32, #tpu.memory_space<vmem>>, vector<32x32xf32>,
      %68 = vector.extract_strided_slice %66 {offsets = [0, 0], sizes = [16, 32], strides = [1, 1]} : vector<32x32xf32> to vector<16x32xf32>
      %c48 = arith.constant 48 : index
      %c0_28 = arith.constant 0 : index
      %69 = vector.load %arg11[%c48, %c0_28] : memref<64x32xf32, #tpu.memory_space<vmem>>, vector<16x32xf32>
      tpu.vector_store %arg11[%c48, %c0_28], %68 {strides = array<i32>} : memref<64x32xf32, #tpu.memory_space<vmem>>, vector<16x32xf32>,
    } else {
    }
    %c3_i32_0 = arith.constant 3 : i32
    %3 = arith.cmpi eq, %arg1, %c3_i32_0 : i32
    %4 = arith.extui %3 : i1 to i32
    %c0_i32_1 = arith.constant 0 : i32
    %5 = arith.cmpi ne, %4, %c0_i32_1 : i32
    scf.if %5 {
      %cst = arith.constant 0.000000e+00 : f32
      %20 = vector.broadcast %cst : f32 to vector<16x32xf32>
      %c48 = arith.constant 48 : index
      %c0 = arith.constant 0 : index
      %21 = vector.load %arg11[%c48, %c0] : memref<64x32xf32, #tpu.memory_space<vmem>>, vector<16x32xf32>
      tpu.vector_store %arg11[%c48, %c0], %20 {strides = array<i32>} : memref<64x32xf32, #tpu.memory_space<vmem>>, vector<16x32xf32>,
    } else {
    }
    %c0_i32_2 = arith.constant 0 : i32
    %6 = arith.cmpi eq, %arg1, %c0_i32_2 : i32
    %7 = arith.extui %6 : i1 to i32
    %c0_i32_3 = arith.constant 0 : i32
    %8 = arith.cmpi ne, %7, %c0_i32_3 : i32
    scf.if %8 {
      %cst = arith.constant 0.000000e+00 : f32
      %20 = vector.broadcast %cst : f32 to vector<16x32xf32>
      %c0 = arith.constant 0 : index
      %c0_11 = arith.constant 0 : index
      %21 = vector.load %arg11[%c0, %c0_11] : memref<64x32xf32, #tpu.memory_space<vmem>>, vector<16x32xf32>
      tpu.vector_store %arg11[%c0, %c0_11], %20 {strides = array<i32>} : memref<64x32xf32, #tpu.memory_space<vmem>>, vector<16x32xf32>,
    } else {
    }
    %c0_i32_4 = arith.constant 0 : i32
    %9 = arith.cmpi sgt, %arg1, %c0_i32_4 : i32
    %10 = arith.extui %9 : i1 to i32
    %c0_i32_5 = arith.constant 0 : i32
    %11 = arith.cmpi ne, %10, %c0_i32_5 : i32
    scf.if %11 {
      %c0 = arith.constant 0 : index
      %c0_11 = arith.constant 0 : index
      %20 = vector.load %arg6[%c0, %c0_11] : memref<31x32xf32, #tpu.memory_space<vmem>>, vector<31x32xf32>
      %cst = arith.constant 0.000000e+00 : f32
      %21 = vector.broadcast %cst : f32 to vector<32x32xf32>
      %c1 = arith.constant 1 : index
      %c0_12 = arith.constant 0 : index
      %22 = vector.load %arg11[%c1, %c0_12] : memref<64x32xf32, #tpu.memory_space<vmem>>, vector<32x32xf32>
      %23 = vector.extract_strided_slice %20 {offsets = [0, 0], sizes = [1, 32], strides = [1, 1]} : vector<31x32xf32> to vector<1x32xf32>
      %24 = vector.broadcast %23 : vector<1x32xf32> to vector<32x32xf32>
      %25 = arith.mulf %22, %24 : vector<32x32xf32>
      %26 = arith.addf %21, %25 : vector<32x32xf32>
      %c2 = arith.constant 2 : index
      %c0_13 = arith.constant 0 : index
      %27 = vector.load %arg11[%c2, %c0_13] : memref<64x32xf32, #tpu.memory_space<vmem>>, vector<32x32xf32>
      %28 = vector.extract_strided_slice %20 {offsets = [1, 0], sizes = [1, 32], strides = [1, 1]} : vector<31x32xf32> to vector<1x32xf32>
      %29 = vector.broadcast %28 : vector<1x32xf32> to vector<32x32xf32>
      %30 = arith.mulf %27, %29 : vector<32x32xf32>
      %31 = arith.addf %26, %30 : vector<32x32xf32>
      %c3 = arith.constant 3 : index
      %c0_14 = arith.constant 0 : index
      %32 = vector.load %arg11[%c3, %c0_14] : memref<64x32xf32, #tpu.memory_space<vmem>>, vector<32x32xf32>
      %33 = vector.extract_strided_slice %20 {offsets = [2, 0], sizes = [1, 32], strides = [1, 1]} : vector<31x32xf32> to vector<1x32xf32>
      %34 = vector.broadcast %33 : vector<1x32xf32> to vector<32x32xf32>
      %35 = arith.mulf %32, %34 : vector<32x32xf32>
      %36 = arith.addf %31, %35 : vector<32x32xf32>
      %c4 = arith.constant 4 : index
      %c0_15 = arith.constant 0 : index
      %37 = vector.load %arg11[%c4, %c0_15] : memref<64x32xf32, #tpu.memory_space<vmem>>, vector<32x32xf32>
      %38 = vector.extract_strided_slice %20 {offsets = [3, 0], sizes = [1, 32], strides = [1, 1]} : vector<31x32xf32> to vector<1x32xf32>
      %39 = vector.broadcast %38 : vector<1x32xf32> to vector<32x32xf32>
      %40 = arith.mulf %37, %39 : vector<32x32xf32>
      %41 = arith.addf %36, %40 : vector<32x32xf32>
      %c5 = arith.constant 5 : index
      %c0_16 = arith.constant 0 : index
      %42 = vector.load %arg11[%c5, %c0_16] : memref<64x32xf32, #tpu.memory_space<vmem>>, vector<32x32xf32>
      %43 = vector.extract_strided_slice %20 {offsets = [4, 0], sizes = [1, 32], strides = [1, 1]} : vector<31x32xf32> to vector<1x32xf32>
      %44 = vector.broadcast %43 : vector<1x32xf32> to vector<32x32xf32>
      %45 = arith.mulf %42, %44 : vector<32x32xf32>
      %46 = arith.addf %41, %45 : vector<32x32xf32>
      %c6 = arith.constant 6 : index
      %c0_17 = arith.constant 0 : index
      %47 = vector.load %arg11[%c6, %c0_17] : memref<64x32xf32, #tpu.memory_space<vmem>>, vector<32x32xf32>
      %48 = vector.extract_strided_slice %20 {offsets = [5, 0], sizes = [1, 32], strides = [1, 1]} : vector<31x32xf32> to vector<1x32xf32>
      %49 = vector.broadcast %48 : vector<1x32xf32> to vector<32x32xf32>
      %50 = arith.mulf %47, %49 : vector<32x32xf32>
      %51 = arith.addf %46, %50 : vector<32x32xf32>
      %c7 = arith.constant 7 : index
      %c0_18 = arith.constant 0 : index
      %52 = vector.load %arg11[%c7, %c0_18] : memref<64x32xf32, #tpu.memory_space<vmem>>, vector<32x32xf32>
      %53 = vector.extract_strided_slice %20 {offsets = [6, 0], sizes = [1, 32], strides = [1, 1]} : vector<31x32xf32> to vector<1x32xf32>
      %54 = vector.broadcast %53 : vector<1x32xf32> to vector<32x32xf32>
      %55 = arith.mulf %52, %54 : vector<32x32xf32>
      %56 = arith.addf %51, %55 : vector<32x32xf32>
      %c8 = arith.constant 8 : index
      %c0_19 = arith.constant 0 : index
      %57 = vector.load %arg11[%c8, %c0_19] : memref<64x32xf32, #tpu.memory_space<vmem>>, vector<32x32xf32>
      %58 = vector.extract_strided_slice %20 {offsets = [7, 0], sizes = [1, 32], strides = [1, 1]} : vector<31x32xf32> to vector<1x32xf32>
      %59 = vector.broadcast %58 : vector<1x32xf32> to vector<32x32xf32>
      %60 = arith.mulf %57, %59 : vector<32x32xf32>
      %61 = arith.addf %56, %60 : vector<32x32xf32>
      %c9 = arith.constant 9 : index
      %c0_20 = arith.constant 0 : index
      %62 = vector.load %arg11[%c9, %c0_20] : memref<64x32xf32, #tpu.memory_space<vmem>>, vector<32x32xf32>
      %63 = vector.extract_strided_slice %20 {offsets = [8, 0], sizes = [1, 32], strides = [1, 1]} : vector<31x32xf32> to vector<1x32xf32>
      %64 = vector.broadcast %63 : vector<1x32xf32> to vector<32x32xf32>
      %65 = arith.mulf %62, %64 : vector<32x32xf32>
      %66 = arith.addf %61, %65 : vector<32x32xf32>
      %c10 = arith.constant 10 : index
      %c0_21 = arith.constant 0 : index
      %67 = vector.load %arg11[%c10, %c0_21] : memref<64x32xf32, #tpu.memory_space<vmem>>, vector<32x32xf32>
      %68 = vector.extract_strided_slice %20 {offsets = [9, 0], sizes = [1, 32], strides = [1, 1]} : vector<31x32xf32> to vector<1x32xf32>
      %69 = vector.broadcast %68 : vector<1x32xf32> to vector<32x32xf32>
      %70 = arith.mulf %67, %69 : vector<32x32xf32>
      %71 = arith.addf %66, %70 : vector<32x32xf32>
      %c11 = arith.constant 11 : index
      %c0_22 = arith.constant 0 : index
      %72 = vector.load %arg11[%c11, %c0_22] : memref<64x32xf32, #tpu.memory_space<vmem>>, vector<32x32xf32>
      %73 = vector.extract_strided_slice %20 {offsets = [10, 0], sizes = [1, 32], strides = [1, 1]} : vector<31x32xf32> to vector<1x32xf32>
      %74 = vector.broadcast %73 : vector<1x32xf32> to vector<32x32xf32>
      %75 = arith.mulf %72, %74 : vector<32x32xf32>
      %76 = arith.addf %71, %75 : vector<32x32xf32>
      %c12 = arith.constant 12 : index
      %c0_23 = arith.constant 0 : index
      %77 = vector.load %arg11[%c12, %c0_23] : memref<64x32xf32, #tpu.memory_space<vmem>>, vector<32x32xf32>
      %78 = vector.extract_strided_slice %20 {offsets = [11, 0], sizes = [1, 32], strides = [1, 1]} : vector<31x32xf32> to vector<1x32xf32>
      %79 = vector.broadcast %78 : vector<1x32xf32> to vector<32x32xf32>
      %80 = arith.mulf %77, %79 : vector<32x32xf32>
      %81 = arith.addf %76, %80 : vector<32x32xf32>
      %c13 = arith.constant 13 : index
      %c0_24 = arith.constant 0 : index
      %82 = vector.load %arg11[%c13, %c0_24] : memref<64x32xf32, #tpu.memory_space<vmem>>, vector<32x32xf32>
      %83 = vector.extract_strided_slice %20 {offsets = [12, 0], sizes = [1, 32], strides = [1, 1]} : vector<31x32xf32> to vector<1x32xf32>
      %84 = vector.broadcast %83 : vector<1x32xf32> to vector<32x32xf32>
      %85 = arith.mulf %82, %84 : vector<32x32xf32>
      %86 = arith.addf %81, %85 : vector<32x32xf32>
      %c14 = arith.constant 14 : index
      %c0_25 = arith.constant 0 : index
      %87 = vector.load %arg11[%c14, %c0_25] : memref<64x32xf32, #tpu.memory_space<vmem>>, vector<32x32xf32>
      %88 = vector.extract_strided_slice %20 {offsets = [13, 0], sizes = [1, 32], strides = [1, 1]} : vector<31x32xf32> to vector<1x32xf32>
      %89 = vector.broadcast %88 : vector<1x32xf32> to vector<32x32xf32>
      %90 = arith.mulf %87, %89 : vector<32x32xf32>
      %91 = arith.addf %86, %90 : vector<32x32xf32>
      %c15 = arith.constant 15 : index
      %c0_26 = arith.constant 0 : index
      %92 = vector.load %arg11[%c15, %c0_26] : memref<64x32xf32, #tpu.memory_space<vmem>>, vector<32x32xf32>
      %93 = vector.extract_strided_slice %20 {offsets = [14, 0], sizes = [1, 32], strides = [1, 1]} : vector<31x32xf32> to vector<1x32xf32>
      %94 = vector.broadcast %93 : vector<1x32xf32> to vector<32x32xf32>
      %95 = arith.mulf %92, %94 : vector<32x32xf32>
      %96 = arith.addf %91, %95 : vector<32x32xf32>
      %c16 = arith.constant 16 : index
      %c0_27 = arith.constant 0 : index
      %97 = vector.load %arg11[%c16, %c0_27] : memref<64x32xf32, #tpu.memory_space<vmem>>, vector<32x32xf32>
      %98 = vector.extract_strided_slice %20 {offsets = [15, 0], sizes = [1, 32], strides = [1, 1]} : vector<31x32xf32> to vector<1x32xf32>
      %99 = vector.broadcast %98 : vector<1x32xf32> to vector<32x32xf32>
      %100 = arith.mulf %97, %99 : vector<32x32xf32>
      %101 = arith.addf %96, %100 : vector<32x32xf32>
      %c17 = arith.constant 17 : index
      %c0_28 = arith.constant 0 : index
      %102 = vector.load %arg11[%c17, %c0_28] : memref<64x32xf32, #tpu.memory_space<vmem>>, vector<32x32xf32>
      %103 = vector.extract_strided_slice %20 {offsets = [16, 0], sizes = [1, 32], strides = [1, 1]} : vector<31x32xf32> to vector<1x32xf32>
      %104 = vector.broadcast %103 : vector<1x32xf32> to vector<32x32xf32>
      %105 = arith.mulf %102, %104 : vector<32x32xf32>
      %106 = arith.addf %101, %105 : vector<32x32xf32>
      %c18 = arith.constant 18 : index
      %c0_29 = arith.constant 0 : index
      %107 = vector.load %arg11[%c18, %c0_29] : memref<64x32xf32, #tpu.memory_space<vmem>>, vector<32x32xf32>
      %108 = vector.extract_strided_slice %20 {offsets = [17, 0], sizes = [1, 32], strides = [1, 1]} : vector<31x32xf32> to vector<1x32xf32>
      %109 = vector.broadcast %108 : vector<1x32xf32> to vector<32x32xf32>
      %110 = arith.mulf %107, %109 : vector<32x32xf32>
      %111 = arith.addf %106, %110 : vector<32x32xf32>
      %c19 = arith.constant 19 : index
      %c0_30 = arith.constant 0 : index
      %112 = vector.load %arg11[%c19, %c0_30] : memref<64x32xf32, #tpu.memory_space<vmem>>, vector<32x32xf32>
      %113 = vector.extract_strided_slice %20 {offsets = [18, 0], sizes = [1, 32], strides = [1, 1]} : vector<31x32xf32> to vector<1x32xf32>
      %114 = vector.broadcast %113 : vector<1x32xf32> to vector<32x32xf32>
      %115 = arith.mulf %112, %114 : vector<32x32xf32>
      %116 = arith.addf %111, %115 : vector<32x32xf32>
      %c20 = arith.constant 20 : index
      %c0_31 = arith.constant 0 : index
      %117 = vector.load %arg11[%c20, %c0_31] : memref<64x32xf32, #tpu.memory_space<vmem>>, vector<32x32xf32>
      %118 = vector.extract_strided_slice %20 {offsets = [19, 0], sizes = [1, 32], strides = [1, 1]} : vector<31x32xf32> to vector<1x32xf32>
      %119 = vector.broadcast %118 : vector<1x32xf32> to vector<32x32xf32>
      %120 = arith.mulf %117, %119 : vector<32x32xf32>
      %121 = arith.addf %116, %120 : vector<32x32xf32>
      %c21 = arith.constant 21 : index
      %c0_32 = arith.constant 0 : index
      %122 = vector.load %arg11[%c21, %c0_32] : memref<64x32xf32, #tpu.memory_space<vmem>>, vector<32x32xf32>
      %123 = vector.extract_strided_slice %20 {offsets = [20, 0], sizes = [1, 32], strides = [1, 1]} : vector<31x32xf32> to vector<1x32xf32>
      %124 = vector.broadcast %123 : vector<1x32xf32> to vector<32x32xf32>
      %125 = arith.mulf %122, %124 : vector<32x32xf32>
      %126 = arith.addf %121, %125 : vector<32x32xf32>
      %c22 = arith.constant 22 : index
      %c0_33 = arith.constant 0 : index
      %127 = vector.load %arg11[%c22, %c0_33] : memref<64x32xf32, #tpu.memory_space<vmem>>, vector<32x32xf32>
      %128 = vector.extract_strided_slice %20 {offsets = [21, 0], sizes = [1, 32], strides = [1, 1]} : vector<31x32xf32> to vector<1x32xf32>
      %129 = vector.broadcast %128 : vector<1x32xf32> to vector<32x32xf32>
      %130 = arith.mulf %127, %129 : vector<32x32xf32>
      %131 = arith.addf %126, %130 : vector<32x32xf32>
      %c23 = arith.constant 23 : index
      %c0_34 = arith.constant 0 : index
      %132 = vector.load %arg11[%c23, %c0_34] : memref<64x32xf32, #tpu.memory_space<vmem>>, vector<32x32xf32>
      %133 = vector.extract_strided_slice %20 {offsets = [22, 0], sizes = [1, 32], strides = [1, 1]} : vector<31x32xf32> to vector<1x32xf32>
      %134 = vector.broadcast %133 : vector<1x32xf32> to vector<32x32xf32>
      %135 = arith.mulf %132, %134 : vector<32x32xf32>
      %136 = arith.addf %131, %135 : vector<32x32xf32>
      %c24 = arith.constant 24 : index
      %c0_35 = arith.constant 0 : index
      %137 = vector.load %arg11[%c24, %c0_35] : memref<64x32xf32, #tpu.memory_space<vmem>>, vector<32x32xf32>
      %138 = vector.extract_strided_slice %20 {offsets = [23, 0], sizes = [1, 32], strides = [1, 1]} : vector<31x32xf32> to vector<1x32xf32>
      %139 = vector.broadcast %138 : vector<1x32xf32> to vector<32x32xf32>
      %140 = arith.mulf %137, %139 : vector<32x32xf32>
      %141 = arith.addf %136, %140 : vector<32x32xf32>
      %c25 = arith.constant 25 : index
      %c0_36 = arith.constant 0 : index
      %142 = vector.load %arg11[%c25, %c0_36] : memref<64x32xf32, #tpu.memory_space<vmem>>, vector<32x32xf32>
      %143 = vector.extract_strided_slice %20 {offsets = [24, 0], sizes = [1, 32], strides = [1, 1]} : vector<31x32xf32> to vector<1x32xf32>
      %144 = vector.broadcast %143 : vector<1x32xf32> to vector<32x32xf32>
      %145 = arith.mulf %142, %144 : vector<32x32xf32>
      %146 = arith.addf %141, %145 : vector<32x32xf32>
      %c26 = arith.constant 26 : index
      %c0_37 = arith.constant 0 : index
      %147 = vector.load %arg11[%c26, %c0_37] : memref<64x32xf32, #tpu.memory_space<vmem>>, vector<32x32xf32>
      %148 = vector.extract_strided_slice %20 {offsets = [25, 0], sizes = [1, 32], strides = [1, 1]} : vector<31x32xf32> to vector<1x32xf32>
      %149 = vector.broadcast %148 : vector<1x32xf32> to vector<32x32xf32>
      %150 = arith.mulf %147, %149 : vector<32x32xf32>
      %151 = arith.addf %146, %150 : vector<32x32xf32>
      %c27 = arith.constant 27 : index
      %c0_38 = arith.constant 0 : index
      %152 = vector.load %arg11[%c27, %c0_38] : memref<64x32xf32, #tpu.memory_space<vmem>>, vector<32x32xf32>
      %153 = vector.extract_strided_slice %20 {offsets = [26, 0], sizes = [1, 32], strides = [1, 1]} : vector<31x32xf32> to vector<1x32xf32>
      %154 = vector.broadcast %153 : vector<1x32xf32> to vector<32x32xf32>
      %155 = arith.mulf %152, %154 : vector<32x32xf32>
      %156 = arith.addf %151, %155 : vector<32x32xf32>
      %c28 = arith.constant 28 : index
      %c0_39 = arith.constant 0 : index
      %157 = vector.load %arg11[%c28, %c0_39] : memref<64x32xf32, #tpu.memory_space<vmem>>, vector<32x32xf32>
      %158 = vector.extract_strided_slice %20 {offsets = [27, 0], sizes = [1, 32], strides = [1, 1]} : vector<31x32xf32> to vector<1x32xf32>
      %159 = vector.broadcast %158 : vector<1x32xf32> to vector<32x32xf32>
      %160 = arith.mulf %157, %159 : vector<32x32xf32>
      %161 = arith.addf %156, %160 : vector<32x32xf32>
      %c29 = arith.constant 29 : index
      %c0_40 = arith.constant 0 : index
      %162 = vector.load %arg11[%c29, %c0_40] : memref<64x32xf32, #tpu.memory_space<vmem>>, vector<32x32xf32>
      %163 = vector.extract_strided_slice %20 {offsets = [28, 0], sizes = [1, 32], strides = [1, 1]} : vector<31x32xf32> to vector<1x32xf32>
      %164 = vector.broadcast %163 : vector<1x32xf32> to vector<32x32xf32>
      %165 = arith.mulf %162, %164 : vector<32x32xf32>
      %166 = arith.addf %161, %165 : vector<32x32xf32>
      %c30 = arith.constant 30 : index
      %c0_41 = arith.constant 0 : index
      %167 = vector.load %arg11[%c30, %c0_41] : memref<64x32xf32, #tpu.memory_space<vmem>>, vector<32x32xf32>
      %168 = vector.extract_strided_slice %20 {offsets = [29, 0], sizes = [1, 32], strides = [1, 1]} : vector<31x32xf32> to vector<1x32xf32>
      %169 = vector.broadcast %168 : vector<1x32xf32> to vector<32x32xf32>
      %170 = arith.mulf %167, %169 : vector<32x32xf32>
      %171 = arith.addf %166, %170 : vector<32x32xf32>
      %c31 = arith.constant 31 : index
      %c0_42 = arith.constant 0 : index
      %172 = vector.load %arg11[%c31, %c0_42] : memref<64x32xf32, #tpu.memory_space<vmem>>, vector<32x32xf32>
      %173 = vector.extract_strided_slice %20 {offsets = [30, 0], sizes = [1, 32], strides = [1, 1]} : vector<31x32xf32> to vector<1x32xf32>
      %174 = vector.broadcast %173 : vector<1x32xf32> to vector<32x32xf32>
      %175 = arith.mulf %172, %174 : vector<32x32xf32>
      %176 = arith.addf %171, %175 : vector<32x32xf32>
      %c0_43 = arith.constant 0 : index
      %c0_44 = arith.constant 0 : index
      %177 = vector.load %arg7[%c0_43, %c0_44] : memref<1x32xf32, #tpu.memory_space<vmem>>, vector<1x32xf32>
      %178 = vector.broadcast %177 : vector<1x32xf32> to vector<32x32xf32>
      %179 = arith.mulf %176, %178 : vector<32x32xf32>
      %c0_45 = arith.constant 0 : index
      %c0_46 = arith.constant 0 : index
      %180 = vector.load %arg8[%c0_45, %c0_46] : memref<1x32xf32, #tpu.memory_space<vmem>>, vector<1x32xf32>
      %181 = vector.broadcast %180 : vector<1x32xf32> to vector<32x32xf32>
      %182 = arith.addf %179, %181 : vector<32x32xf32>
      %183 = arith.negf %182 : vector<32x32xf32>
      %184 = math.exp %183 : vector<32x32xf32>
      %cst_47 = arith.constant 1.000000e+00 : f32
      %185 = vector.broadcast %cst_47 : f32 to vector<32x32xf32>
      %186 = arith.addf %185, %184 : vector<32x32xf32>
      %187 = arith.divf %185, %186 : vector<32x32xf32>
      %188 = arith.mulf %182, %187 : vector<32x32xf32>
      %189 = arith.truncf %188 : vector<32x32xf32> to vector<32x32xbf16>
      %c0_48 = arith.constant 0 : index
      %c0_49 = arith.constant 0 : index
      %190 = vector.load %arg9[%c0_48, %c0_49] : memref<32x32xbf16, #tpu.memory_space<vmem>>, vector<32x32xbf16>
      %cst_50 = arith.constant dense<0.000000e+00> : vector<32x32xf32>
      %191 = tpu.matmul %189, %190, %cst_50 {dimension_numbers = #tpu.dot_dimension_numbers<[1], [0], [0], [1], [0, 0, 1, 1], [], []>} : vector<32x32xbf16>, vector<32x32xbf16>, vector<32x32xf32> -> vector<32x32xf32>
      %c0_51 = arith.constant 0 : index
      %c0_52 = arith.constant 0 : index
      %c0_53 = arith.constant 0 : index
      %192 = vector.load %arg10[%c0_51, %c0_52, %c0_53] : memref<1x32x32xf32, #tpu.memory_space<vmem>>, vector<1x32x32xf32>
      %193 = vector.shape_cast %192 : vector<1x32x32xf32> to vector<32x32xf32>
      %194 = vector.shape_cast %191 : vector<32x32xf32> to vector<1x32x32xf32>
      tpu.vector_store %arg10[%c0_51, %c0_52, %c0_53], %194 {strides = array<i32>} : memref<1x32x32xf32, #tpu.memory_space<vmem>>, vector<1x32x32xf32>,
    } else {
    }
    %c0_i32_6 = arith.constant 0 : i32
    %12 = arith.cmpi sgt, %arg1, %c0_i32_6 : i32
    %c3_i32_7 = arith.constant 3 : i32
    %13 = arith.cmpi slt, %arg1, %c3_i32_7 : i32
    %14 = arith.andi %12, %13 : i1
    %15 = arith.extui %14 : i1 to i32
    %c0_i32_8 = arith.constant 0 : i32
    %16 = arith.cmpi ne, %15, %c0_i32_8 : i32
    scf.if %16 {
      %c32 = arith.constant 32 : index
      %c0 = arith.constant 0 : index
      %20 = vector.load %arg11[%c32, %c0] : memref<64x32xf32, #tpu.memory_space<vmem>>, vector<16x32xf32>
      %c0_11 = arith.constant 0 : index
      %c0_12 = arith.constant 0 : index
      %21 = vector.load %arg11[%c0_11, %c0_12] : memref<64x32xf32, #tpu.memory_space<vmem>>, vector<16x32xf32>
      tpu.vector_store %arg11[%c0_11, %c0_12], %20 {strides = array<i32>} : memref<64x32xf32, #tpu.memory_space<vmem>>, vector<16x32xf32>,
    } else {
    }
    %c3_i32_9 = arith.constant 3 : i32
    %17 = arith.cmpi slt, %arg1, %c3_i32_9 : i32
    %18 = arith.extui %17 : i1 to i32
    %c0_i32_10 = arith.constant 0 : i32
    %19 = arith.cmpi ne, %18, %c0_i32_10 : i32
    scf.if %19 {
      %c0 = arith.constant 0 : index
      %c0_11 = arith.constant 0 : index
      %20 = vector.load %arg12[%c0, %c0_11] : memref<32x32xf32, #tpu.memory_space<vmem>>, vector<32x32xf32>
      %c16 = arith.constant 16 : index
      %c0_12 = arith.constant 0 : index
      %21 = vector.load %arg11[%c16, %c0_12] : memref<64x32xf32, #tpu.memory_space<vmem>>, vector<32x32xf32>
      tpu.vector_store %arg11[%c16, %c0_12], %20 {strides = array<i32>} : memref<64x32xf32, #tpu.memory_space<vmem>>, vector<32x32xf32>,
    } else {
    }
    return
  }
  func.func @transform_0(%arg0: i32, %arg1: i32) -> (i32, i32, i32) {
    %c2_i32 = arith.constant 2 : i32
    %0 = arith.minsi %arg1, %c2_i32 : i32
    %c0_i32 = arith.constant 0 : i32
    %c0_i32_0 = arith.constant 0 : i32
    return %arg0, %0, %c0_i32 : i32, i32, i32
  }
  func.func @transform_1(%arg0: i32, %arg1: i32) -> (i32, i32) {
    %c0_i32 = arith.constant 0 : i32
    %c0_i32_0 = arith.constant 0 : i32
    %c0_i32_1 = arith.constant 0 : i32
    return %c0_i32, %c0_i32_0 : i32, i32
  }
  func.func @transform_2(%arg0: i32, %arg1: i32) -> (i32, i32) {
    %c0_i32 = arith.constant 0 : i32
    %c0_i32_0 = arith.constant 0 : i32
    %c0_i32_1 = arith.constant 0 : i32
    return %c0_i32, %c0_i32_0 : i32, i32
  }
  func.func @transform_3(%arg0: i32, %arg1: i32) -> (i32, i32) {
    %c0_i32 = arith.constant 0 : i32
    %c0_i32_0 = arith.constant 0 : i32
    %c0_i32_1 = arith.constant 0 : i32
    return %c0_i32, %c0_i32_0 : i32, i32
  }
  func.func @transform_4(%arg0: i32, %arg1: i32) -> (i32, i32) {
    %c0_i32 = arith.constant 0 : i32
    %c0_i32_0 = arith.constant 0 : i32
    %c0_i32_1 = arith.constant 0 : i32
    return %c0_i32, %c0_i32_0 : i32, i32
  }
  func.func @transform_5(%arg0: i32, %arg1: i32) -> (i32, i32) {
    %c0_i32 = arith.constant 0 : i32
    %c0_i32_0 = arith.constant 0 : i32
    %c0_i32_1 = arith.constant 0 : i32
    return %c0_i32, %c0_i32_0 : i32, i32
  }
  func.func @transform_6(%arg0: i32, %arg1: i32) -> (i32, i32) {
    %c0_i32 = arith.constant 0 : i32
    %c0_i32_0 = arith.constant 0 : i32
    %c0_i32_1 = arith.constant 0 : i32
    return %c0_i32, %c0_i32_0 : i32, i32
  }
  func.func @transform_7(%arg0: i32, %arg1: i32) -> (i32, i32) {
    %c0_i32 = arith.constant 0 : i32
    %c0_i32_0 = arith.constant 0 : i32
    %c0_i32_1 = arith.constant 0 : i32
    return %c0_i32, %c0_i32_0 : i32, i32
  }
  func.func @transform_8(%arg0: i32, %arg1: i32) -> (i32, i32, i32) {
    %c1_i32 = arith.constant 1 : i32
    %0 = arith.subi %arg1, %c1_i32 : i32
    %c0_i32 = arith.constant 0 : i32
    %1 = arith.maxsi %0, %c0_i32 : i32
    %c0_i32_0 = arith.constant 0 : i32
    %c0_i32_1 = arith.constant 0 : i32
    return %arg0, %1, %c0_i32_0 : i32, i32, i32
  }
}

</mosaic_0001>

<bundles_post_ra>
// kernel: tpu_custom_call.1
= control target key start
LH: loop header
LB: loop body
LE: loop exit
PB: predicated region body
PF: predicated region fallthrough
CT: control target
= control target key end

     0   :  { %s1523_s27 = smov 0   ;;  %s1525_s28 = smov 0   ;;  %s2000_s0 = inlined_call_operand.vmem [shape: f32[2,96,32], index: 0, kind: input, shape index: {}]   ;;  %s2001_s1 = inlined_call_operand.vmem [shape: f32[1,32], index: 1, kind: input, shape index: {}]   ;;  %s2002_s2 = inlined_call_operand.vmem [shape: f32[1,32], index: 2, kind: input, shape index: {}]   ;;  %s2003_s3 = inlined_call_operand.vmem [shape: bf16[32,64], index: 3, kind: input, shape index: {}]   ;;  %s2004_s4 = inlined_call_operand.vmem [shape: f32[31,32], index: 4, kind: input, shape index: {}]   ;;  %s2005_s5 = inlined_call_operand.vmem [shape: f32[1,32], index: 5, kind: input, shape index: {}]   ;;  %s2006_s6 = inlined_call_operand.vmem [shape: f32[1,32], index: 6, kind: input, shape index: {}]   ;;  %s2007_s7 = inlined_call_operand.vmem [shape: bf16[32,32], index: 7, kind: input, shape index: {}]   ;;  %s2008_s8 = inlined_call_operand.vmem [shape: f32[2,96,32], index: 8, kind: output, shape index: {}]  }
   0x1   :  { %s1527_s29 = smov 0   ;;  %s1529_s30 = smov 0  }
   0x2   :  { %s1531_s9 = smov 0  }
   0x3 LB: > { %s27_s10 = sadd.s32 1, %s1464_s29  ;;  %s30_s11 = sadd.s32 1, %s1468_s30  ;;  %s1472_s9 = sphi %s1531_s9, %s18_s9   ;;  %s1468_s30 = sphi %s1529_s30, %s2012_s30   ;;  %s1464_s29 = sphi %s1527_s29, %s2011_s29   ;;  %s1460_s28 = sphi %s1525_s28, %s2010_s28   ;;  %s1456_s27 = sphi %s1523_s27, %s2009_s27  }
   0x4   : > { %p28_p0 = scmp.ge.s32.totalorder %s27_s10, 4  ;;  %p1293_p1 = scmp.ge.s32.totalorder %s1472_s9, 1 }
   0x5   : > { %p297_p2 = scmp.lt.s32.totalorder %s1472_s9, 9 }
   0x6   : > { %s2014_s10 = smov (%p28_p0, %s27_s10), 0  ;;  %s2016_s11 = smov (!%p28_p0, %s30_s11), %s1468_s30 }
   0x7   : > { %p298_p3 = pnand %p1293_p1, %p297_p2  ;;  %p32_p4 = scmp.ge.s32.totalorder %s2016_s11, 2 }
   0x8   : > { %p344_p5 = scmp.lt.s32.totalorder (!%p298_p3), %s1456_s27, 2  ;;  %p347_p6 = scmp.lt.s32.totalorder (!%p298_p3), %s1460_s28, 1 }
   0x9   : > { %s2018_s11 = smov (%p32_p4, %s2016_s11), 0  ;;  %301 = sbr.rel (%p298_p3) target bundleno = 889 (0x379), region = 52 }
   0xa   : > { %s1296_s12 = sadd.s32 (!%p298_p3), 4294967295, %s1456_s27  ;;  %p375_p7 = scmp.lt.s32.totalorder (!%p298_p3), %s1456_s27, 3 }
   0xb   : > { %p359_p8 = scmp.gt.s32.totalorder (!%p298_p3), %s1296_s12, 0  ;;  %p1299_p11 = scmp.ge.s32.totalorder (!%p298_p3), %s1456_s27, 3 }
   0xe   : > { %s345_s13 = scalar_select %p344_p5, %s1456_s27, 2 }
   0xf   : > { %s2020_s28 = smov (!%p347_p6, %s1460_s28), 1  ;;  %s2022_s12 = smov (!%p359_p8, %s1296_s12), 0 }
  0x10   : > { %s1294_s14 = sshll.u32 %s345_s13, 2  ;;  %s1343_s15 = smul.u32 12, %s2020_s28 }
  0x11   : > { %p349_p9 = scmp.lt.s32.totalorder %s1294_s14, 11  ;;  %s1297_s16 = sshll.u32 %s2022_s12, 2 }
  0x12   : > { %p364_p10 = scmp.lt.s32.totalorder %s1297_s16, 11  ;;  %s1475_s19 = smov (!%p1299_p11), 96  }
  0x13   : > { %s2024_s14 = smov (!%p349_p9, %s1294_s14), 11  ;;  %378 = sbr.rel (%p1299_p11) target bundleno = 588 (0x24c), region = 56 }
  0x14   : > { %s352_s17 = sadd.s32 %s1343_s15, %s2024_s14  ;;  %s2026_s16 = smov (!%p364_p10, %s1297_s16), 11 }
  0x15   : > { %s1295_s18 = sshll.u32 %s352_s17, 3  ;;  %s367_s22 = sadd.s32 %s1343_s15, %s2026_s16 }
  0x16   : > { %s354_s21 = scalar_lea.vmem %s2000_s0, %s1295_s18  ;;  %s1298_s23 = sshll.u32 %s367_s22, 3 }
  0x17   : > { %s1565_s26 = scalar_lea.vmem %s2008_s8, %s1298_s23  ;;  %s1314_s20 = sshll.u32 (!%p1299_p11), %s1456_s27, 5 }
  0x18   : > { %v381_v0 = vld [vmem:[%s354_s21 + $0x10] sm:$0xff]  ;;  %vm383_vm0 = vcmask 261120   ;;  %v379_v1 = vld [vmem:[%s354_s21] sm:$0xff]  ;;  %v382_v4 = vld [vmem:[%s354_s21 + $0x18] sm:$0xff]  ;;  %v1474_v8 = vmov 32.0  }
  0x19   : > { %v390_v2 = vsel %vm383_vm0, %v381_v0, 0.0  ;;  %v384_v3 = vsel %vm383_vm0, %v379_v1, 0.0  ;;  %v380_v5 = vld [vmem:[%s354_s21 + $0x8] sm:$0xff]  ;;  %v393_v6 = vsel %vm383_vm0, %v382_v4, 0.0  ;;  %1390 = vrcp.f32 %v1474_v8  ;;  %v1335_v40 = vld [vmem:[%s2003_s3] sm:$0xff] }
  0x1a   : > { %391 = vadd.xlane.f32.xlu1 %v390_v2  ;;  %385 = vadd.xlane.f32.xlu0 %v384_v3  ;;  %v387_v7 = vsel %vm383_vm0, %v380_v5, 0.0  ;;  %v1336_v35 = vld [vmem:[%s2003_s3 + $0x8] sm:$0xff] }
  0x1b   : > { %525 = vmatpush.bf16.msra.mxu0 %v1336_v35  ;;  %1339 = vmatpush.bf16.msra.mxu1 %v1336_v35 }
  0x1f   : > { %v1391_v9 = vpop.eup %1390  ;;  %526 = vmatpush.bf16.msra.mxu0 %v1335_v40  ;;  %1340 = vmatpush.bf16.msra.mxu1 %v1335_v40 }
  0x20   : > { %v397_v10 = vmul.f32 32.0, %v1391_v9  ;;  %vm401_vm1 = vweird.f32 %v1391_v9 }
  0x22   : > { %394 = vadd.xlane.f32.xlu1 %v393_v6  ;;  %388 = vadd.xlane.f32.xlu0 %v387_v7  ;;  %v398_v11 = vsub.f32 1.0, %v397_v10  ;;  %v1388_v10 = vld [vmem:[%s2001_s1] ss:$0 sm:$0xff] }
  0x24   : > { %v399_v12 = vmul.f32 %v1391_v9, %v398_v11 }
  0x26   : > { %v400_v13 = vadd.f32 %v1391_v9, %v399_v12 }
  0x28   : > { %v402_v14 = vsel %vm401_vm1, %v1391_v9, %v400_v13 }
  0x8d   : > { %v392_v15 = vpop.xlane.xlu1 %391  ;;  %v386_v16 = vpop.xlane.xlu0 %385 }
  0x8e   : > { %v405_v17 = vmul.f32 %v402_v14, %v392_v15  ;;  %v403_v18 = vmul.f32 %v402_v14, %v386_v16 }
  0x90   : > { %v1574_v19 = vsub.f32 %v381_v0, %v405_v17  ;;  %v1576_v20 = vsub.f32 %v379_v1, %v403_v18  ;;  %v1389_v17 = vld [vmem:[%s2002_s2] ss:$0 sm:$0xff] }
  0x92   : > { %v413_v21 = vmul.f32 %v1574_v19, %v1574_v19  ;;  %v411_v22 = vmul.f32 %v1576_v20, %v1576_v20 }
  0x94   : > { %v421_v23 = vsel %vm383_vm0, %v413_v21, 0.0  ;;  %v415_v24 = vsel %vm383_vm0, %v411_v22, 0.0 }
  0x95   : > { %v395_v25 = vpop.xlane.xlu1 %394  ;;  %422 = vadd.xlane.f32.xlu0 %v421_v23  ;;  %416 = vadd.xlane.f32.xlu2 %v415_v24  ;;  %v389_v26 = vpop.xlane.xlu0 %388 }
  0x96   : > { %v406_v27 = vmul.f32 %v402_v14, %v395_v25  ;;  %v404_v28 = vmul.f32 %v402_v14, %v389_v26 }
  0x98   : > { %v1584_v29 = vsub.f32 %v382_v4, %v406_v27  ;;  %v1586_v30 = vsub.f32 %v380_v5, %v404_v28 }
  0x9a   : > { %v414_v31 = vmul.f32 %v1584_v29, %v1584_v29  ;;  %v412_v32 = vmul.f32 %v1586_v30, %v1586_v30 }
  0x9c   : > { %v424_v33 = vsel %vm383_vm0, %v414_v31, 0.0  ;;  %v418_v34 = vsel %vm383_vm0, %v412_v32, 0.0 }
  0x9d   : > { %425 = vadd.xlane.f32.xlu1 %v424_v33  ;;  %419 = vadd.xlane.f32.xlu2 %v418_v34 }
 0x108   : > { %v417_v36 = vpop.xlane.xlu2 %416  ;;  %v423_v37 = vpop.xlane.xlu0 %422 }
 0x109   : > { %v427_v38 = vmul.f32 %v417_v36, %v402_v14  ;;  %v429_v39 = vmul.f32 %v423_v37, %v402_v14 }
 0x10b   : > { %v431_v41 = vadd.f32 1e-05, %v427_v38  ;;  %v433_v42 = vadd.f32 1e-05, %v429_v39 }
 0x10d   : > { %1392 = vrsqrt.f32 %v431_v41  ;;  %vm461_vm2 = vweird.f32 %v433_v42  ;;  %vm441_vm5 = vweird.f32 %v431_v41 }
 0x10e   : > { %1394 = vrsqrt.f32 %v433_v42 }
 0x110   : > { %v426_v43 = vpop.xlane.xlu1 %425  ;;  %v420_v44 = vpop.xlane.xlu2 %419 }
 0x111   : > { %v430_v45 = vmul.f32 %v426_v43, %v402_v14  ;;  %v428_v46 = vmul.f32 %v420_v44, %v402_v14 }
 0x113   : > { %v1393_v47 = vpop.eup %1392  ;;  %v434_v48 = vadd.f32 1e-05, %v430_v45  ;;  %v432_v49 = vadd.f32 1e-05, %v428_v46 }
 0x114   : > { %v1395_v50 = vpop.eup %1394  ;;  %v436_v51 = vmul.f32 %v1393_v47, %v431_v41  ;;  %vm442_vm4 = vweird.f32 %v1393_v47 }
 0x115   : > { %v456_v52 = vmul.f32 %v1395_v50, %v433_v42  ;;  %1396 = vrsqrt.f32 %v434_v48  ;;  %vm462_vm3 = vweird.f32 %v1395_v50  ;;  %vm443_vm7 = vmor %vm441_vm5, %vm442_vm4  ;;  %vm471_vm8 = vweird.f32 %v434_v48 }
 0x116   : > { %v437_v53 = vmul.f32 %v1393_v47, %v436_v51  ;;  %1398 = vrsqrt.f32 %v432_v49  ;;  %vm463_vm6 = vmor %vm461_vm2, %vm462_vm3  ;;  %vm451_vm12 = vweird.f32 %v432_v49 }
 0x117   : > { %v457_v54 = vmul.f32 %v1395_v50, %v456_v52 }
 0x118   : > { %v438_v55 = vmul.f32 0.5, %v437_v53 }
 0x119   : > { %v458_v56 = vmul.f32 0.5, %v457_v54 }
 0x11a   : > { %v439_v57 = vsub.f32 1.5, %v438_v55 }
 0x11b   : > { %v1397_v58 = vpop.eup %1396  ;;  %v459_v59 = vsub.f32 1.5, %v458_v56 }
 0x11c   : > { %v1399_v60 = vpop.eup %1398  ;;  %v466_v61 = vmul.f32 %v1397_v58, %v434_v48  ;;  %v440_v62 = vmul.f32 %v1393_v47, %v439_v57  ;;  %vm472_vm9 = vweird.f32 %v1397_v58 }
 0x11d   : > { %v460_v63 = vmul.f32 %v1395_v50, %v459_v59  ;;  %v446_v0 = vmul.f32 %v1399_v60, %v432_v49  ;;  %vm452_vm10 = vweird.f32 %v1399_v60  ;;  %vm473_vm11 = vmor %vm471_vm8, %vm472_vm9 }
 0x11e   : > { %v467_v1 = vmul.f32 %v1397_v58, %v466_v61  ;;  %v444_v5 = vsel %vm443_vm7, %v1393_v47, %v440_v62  ;;  %vm453_vm13 = vmor %vm451_vm12, %vm452_vm10 }
 0x11f   : > { %v447_v2 = vmul.f32 %v1399_v60, %v446_v0  ;;  %v464_v3 = vsel %vm463_vm6, %v1395_v50, %v460_v63  ;;  %v475_v11 = vmul.f32 %v444_v5, %v1576_v20 }
 0x120   : > { %v468_v4 = vmul.f32 0.5, %v467_v1  ;;  %v477_v8 = vmul.f32 %v464_v3, %v1574_v19 }
 0x121   : > { %v448_v6 = vmul.f32 0.5, %v447_v2  ;;  %v483_v21 = vmul.f32 %v1388_v10, %v475_v11 }
 0x122   : > { %v469_v7 = vsub.f32 1.5, %v468_v4  ;;  %v485_v18 = vmul.f32 %v1388_v10, %v477_v8 }
 0x123   : > { %v449_v9 = vsub.f32 1.5, %v448_v6  ;;  %v491_v25 = vadd.f32 %v1389_v17, %v483_v21 }
 0x124   : > { %v470_v12 = vmul.f32 %v1397_v58, %v469_v7  ;;  %v493_v20 = vadd.f32 %v1389_v17, %v485_v18 }
 0x125   : > { %v450_v13 = vmul.f32 %v1399_v60, %v449_v9 }
 0x126   : > { %v474_v14 = vsel %vm473_vm11, %v1397_v58, %v470_v12 }
 0x127   : > { %v478_v15 = vmul.f32 %v474_v14, %v1584_v29  ;;  %v454_v16 = vsel %vm453_vm13, %v1399_v60, %v450_v13 }
 0x128   : > { %v476_v19 = vmul.f32 %v454_v16, %v1586_v30 }
 0x129   : > { %v486_v22 = vmul.f32 %v1388_v10, %v478_v15 }
 0x12a   : > { %v484_v23 = vmul.f32 %v1388_v10, %v476_v19 }
 0x12b   : > { %v494_v24 = vadd.f32 %v1389_v17, %v486_v22  ;;  %v635_v22 = vlaneseq }
 0x12c   : > { %v492_v26 = vadd.f32 %v1389_v17, %v484_v23 }
 0x12d   : > { %v496_v27 = vpack.c.bf16 %v494_v24, %v493_v20  ;;  %v636_v23 = vshrl.u32 %v635_v22, 7  ;;  %v640_v20 = vstv %s1314_s20 }
 0x12e   : > { %v495_v28 = vpack.c.bf16 %v492_v26, %v491_v25 }
 0x12f   : > { %1309 = vmatmul.msk.bf16.vlgmr.msra.gmra.mxu1 %vm383_vm0, %v496_v27  ;;  %v641_v24 = vadd.s32 %v640_v20, %v636_v23  ;;  %v639_v26 = vadd.s32 24, %v636_v23 }
 0x130   : > { %1308 = vmatmul.msk.bf16.vlgmr.msra.gmra.mxu0 %vm383_vm0, %v495_v28 }
 0x1ac   : > { %v1612_v29 = vpop.f32.mrf.mxu1 }
 0x1ad   : > { %v1614_v31 = vpop.f32.mrf.mxu0  ;;  %v1312_v32 = vmul.f32 -1.442695, %v1612_v29 }
 0x1ae   : > { %v1310_v30 = vmul.f32 -1.442695, %v1614_v31 }
 0x1af   : > { %1400 = vpow2.f32 %v1312_v32  ;;  %v644_v32 = vadd.s32 %v640_v20, %v639_v26 }
 0x1b0   : > { %1402 = vpow2.f32 %v1310_v30 }
 0x1b4   : > { %v1618_v33 = vpop.f32.mrf.mxu1 }
 0x1b5   : > { %v1401_v34 = vpop.eup %1400  ;;  %v1620_v35 = vpop.f32.mrf.mxu0  ;;  %v1313_v36 = vmul.f32 -1.442695, %v1618_v33 }
 0x1b6   : > { %v1403_v37 = vpop.eup %1402  ;;  %v552_v38 = vadd.f32 1.0, %v1401_v34  ;;  %v1311_v39 = vmul.f32 -1.442695, %v1620_v35 }
 0x1b7   : > { %v550_v40 = vadd.f32 1.0, %v1403_v37  ;;  %1404 = vpow2.f32 %v1313_v36  ;;  %v638_v37 = vadd.s32 16, %v636_v23 }
 0x1b8   : > { %1406 = vrcp.f32 %v552_v38  ;;  %v593_v51 = vand.u32 2147483647, %v552_v38  ;;  %v595_v52 = vand.u32 2147483648, %v552_v38  ;;  %vm589_vm1 = vweird.f32 %v552_v38 }
 0x1b9   : > { %1408 = vrcp.f32 %v550_v40  ;;  %v565_v53 = vand.u32 2147483648, %v550_v40  ;;  %v563_v56 = vand.u32 2147483647, %v550_v40  ;;  %vm559_vm2 = vweird.f32 %v550_v40 }
 0x1ba   : > { %1410 = vpow2.f32 %v1311_v39  ;;  %v596_v60 = vor.u32 1.1754944e-38, %v595_v52  ;;  %vm594_vm5 = vcmp.eq.f32.partialorder %v593_v51, 8.507059e+37 }
 0x1bb   : > { %v566_v61 = vor.u32 1.1754944e-38, %v565_v53  ;;  %vm564_vm6 = vcmp.eq.f32.partialorder %v563_v56, 8.507059e+37 }
 0x1bd   : > { %v1405_v41 = vpop.eup %1404 }
 0x1be   : > { %v1407_v42 = vpop.eup %1406  ;;  %v553_v43 = vadd.f32 1.0, %v1405_v41  ;;  %v637_v41 = vadd.s32 8, %v636_v23 }
 0x1bf   : > { %v1409_v44 = vpop.eup %1408  ;;  %v585_v45 = vmul.f32 %v1407_v42, %v552_v38  ;;  %vm590_vm14 = vweird.f32 %v1407_v42  ;;  %v643_v38 = vadd.s32 %v640_v20, %v638_v37 }
 0x1c0   : > { %v1411_v46 = vpop.eup %1410  ;;  %1412 = vrcp.f32 %v553_v43  ;;  %v555_v47 = vmul.f32 %v1409_v44, %v550_v40  ;;  %vm560_vm15 = vweird.f32 %v1409_v44  ;;  %vm591_vm3 = vmor %vm589_vm1, %vm590_vm14  ;;  %v610_v6 = vand.u32 2147483648, %v553_v43 }
 0x1c1   : > { %v551_v48 = vadd.f32 1.0, %v1411_v46  ;;  %v586_v49 = vsub.f32 1.0, %v585_v45  ;;  %vm561_vm4 = vmor %vm559_vm2, %vm560_vm15  ;;  %v608_v8 = vand.u32 2147483647, %v553_v43  ;;  %vm604_vm8 = vweird.f32 %v553_v43 }
 0x1c2   : > { %v556_v50 = vsub.f32 1.0, %v555_v47  ;;  %v611_v14 = vor.u32 1.1754944e-38, %v610_v6  ;;  %vm645_vm15 = vcmp.lt.s32.totalorder %v641_v24, 72  ;;  %vm648_vm1 = vcmp.lt.s32.totalorder %v644_v32, 72 }
 0x1c3   : > { %1414 = vrcp.f32 %v551_v48  ;;  %v587_v54 = vmul.f32 %v1407_v42, %v586_v49  ;;  %v580_v10 = vand.u32 2147483648, %v551_v48  ;;  %v578_v13 = vand.u32 2147483647, %v551_v48 }
 0x1c4   : > { %v557_v55 = vmul.f32 %v1409_v44, %v556_v50  ;;  %vm609_vm11 = vcmp.eq.f32.partialorder %v608_v8, 8.507059e+37  ;;  %vm574_vm12 = vweird.f32 %v551_v48  ;;  %vm647_vm2 = vcmp.lt.s32.totalorder %v643_v38, 72 }
 0x1c5   : > { %v588_v57 = vadd.f32 %v1407_v42, %v587_v54  ;;  %v581_v18 = vor.u32 1.1754944e-38, %v580_v10  ;;  %vm579_vm14 = vcmp.eq.f32.partialorder %v578_v13, 8.507059e+37 }
 0x1c6   : > { %v1413_v58 = vpop.eup %1412  ;;  %v558_v59 = vadd.f32 %v1409_v44, %v557_v55 }
 0x1c7   : > { %v592_v62 = vsel %vm591_vm3, %v1407_v42, %v588_v57  ;;  %v600_v63 = vmul.f32 %v1413_v58, %v553_v43  ;;  %vm605_vm7 = vweird.f32 %v1413_v58  ;;  %v642_v42 = vadd.s32 %v640_v20, %v637_v41 }
 0x1c8   : > { %v562_v0 = vsel %vm561_vm4, %v1409_v44, %v558_v59  ;;  %v597_v1 = vsel %vm594_vm5, %v596_v60, %v592_v62  ;;  %vm606_vm10 = vmor %vm604_vm8, %vm605_vm7 }
 0x1c9   : > { %v1415_v2 = vpop.eup %1414  ;;  %v567_v3 = vsel %vm564_vm6, %v566_v61, %v562_v0  ;;  %622 = vrot.lane.b32.xlu1 %v597_v1, %s1475_s19  ;;  %v601_v4 = vsub.f32 1.0, %v600_v63  ;;  %vm646_vm3 = vcmp.lt.s32.totalorder %v642_v42, 72 }
 0x1ca   : > { %618 = vrot.lane.b32.xlu2 %v567_v3, %s1475_s19  ;;  %v570_v5 = vmul.f32 %v1415_v2, %v551_v48  ;;  %vm575_vm9 = vweird.f32 %v1415_v2 }
 0x1cb   : > { %v602_v7 = vmul.f32 %v1413_v58, %v601_v4  ;;  %vm576_vm13 = vmor %vm574_vm12, %vm575_vm9 }
 0x1cc   : > { %v571_v9 = vsub.f32 1.0, %v570_v5 }
 0x1cd   : > { %v603_v11 = vadd.f32 %v1413_v58, %v602_v7 }
 0x1ce   : > { %v572_v12 = vmul.f32 %v1415_v2, %v571_v9 }
 0x1cf   : > { %v607_v15 = vsel %vm606_vm10, %v1413_v58, %v603_v11 }
 0x1d0   : > { %v573_v16 = vadd.f32 %v1415_v2, %v572_v12  ;;  %v612_v17 = vsel %vm609_vm11, %v611_v14, %v607_v15 }
 0x1d2   : > { %v577_v19 = vsel %vm576_vm13, %v1415_v2, %v573_v16  ;;  %624 = vrot.lane.b32.xlu2 %v612_v17, %s1475_s19 }
 0x1d3   : > { %v582_v21 = vsel %vm579_vm14, %v581_v18, %v577_v19 }
 0x1d4   : > { %620 = vrot.lane.b32.xlu0 %v582_v21, %s1475_s19 }
 0x224   : > { %v619_v25 = vpop.permute.xlu2 %618 }
 0x225   : > { %v630_v27 = vmul.f32 %v619_v25, %v1614_v31 }
 0x227   : > { %v657_v28 = vsel %vm645_vm15, %v630_v27, 0.0 }
 0x228   : > { %661 = vst.msk [vmem:[#allocation3] sm:$0xff] %vm383_vm0, %v657_v28 }
 0x229   : > { %665 = vst.msk [vmem:[#allocation2 + $0x30] sm:$0xff] %vm383_vm0, %v657_v28 }
 0x22c   : > { %v625_v30 = vpop.permute.xlu2 %624 }
 0x22d   : > { %v633_v34 = vmul.f32 %v625_v30, %v1618_v33 }
 0x22f   : > { %v660_v36 = vsel %vm648_vm1, %v633_v34, 0.0 }
 0x230   : > { %664 = vst.msk [vmem:[#allocation3 + $0x18] sm:$0xff] %vm383_vm0, %v660_v36 }
 0x23b   : > { %v623_v39 = vpop.permute.xlu1 %622 }
 0x23c   : > { %v632_v40 = vmul.f32 %v623_v39, %v1612_v29 }
 0x23e   : > { %v659_v31 = vsel %vm647_vm2, %v632_v40, 0.0 }
 0x23f   : > { %663 = vst.msk [vmem:[#allocation3 + $0x10] sm:$0xff] %vm383_vm0, %v659_v31 }
 0x246   : > { %v621_v43 = vpop.permute.xlu0 %620 }
 0x247   : > { %v631_v44 = vmul.f32 %v621_v43, %v1620_v35 }
 0x249   : > { %v658_v45 = vsel %vm646_vm3, %v631_v44, 0.0 }
 0x24a   : > { %662 = vst.msk [vmem:[#allocation3 + $0x8] sm:$0xff] %vm383_vm0, %v658_v45 }
 0x24b   : > { %666 = vst.msk [vmem:[#allocation2 + $0x38] sm:$0xff] %vm383_vm0, %v658_v45 }
 0x24c PF: > { %p1315_p12 = scmp.ne.s32.totalorder %s1456_s27, 3 }
 0x24e   : > { %670 = sbr.rel (%p1315_p12) target bundleno = 598 (0x256), region = 60 }
 0x253   : > { %vm671_vm4 = vcmask 261120   ;;  %v1476_v29 = vmov 0.0  }
 0x254   : > { %672 = vst.msk [vmem:[#allocation2 + $0x30] sm:$0xff] %vm671_vm4, %v1476_v29 }
 0x255   : > { %673 = vst.msk [vmem:[#allocation2 + $0x38] sm:$0xff] %vm671_vm4, %v1476_v29 }
 0x256 PF: > { %p1316_p13 = scmp.ne.s32.totalorder %s1456_s27, 0 }
 0x258   : > { %677 = sbr.rel (%p1316_p13) target bundleno = 608 (0x260), region = 64 }
 0x25d   : > { %vm678_vm5 = vcmask 261120   ;;  %v1477_v33 = vmov 0.0  }
 0x25e   : > { %679 = vst.msk [vmem:[#allocation2] sm:$0xff] %vm678_vm5, %v1477_v33 }
 0x25f   : > { %680 = vst.msk [vmem:[#allocation2 + $0x8] sm:$0xff] %vm678_vm5, %v1477_v33 }
 0x260 PF: > { %p681_p0 = scmp.gt.s32.totalorder %s1456_s27, 0  ;;  %p1317_p1 = scmp.le.s32.totalorder %s1456_s27, 0 }
 0x262   : > { %684 = sbr.rel (%p1317_p1) target bundleno = 869 (0x365), region = 68 }
 0x267   : > { %v1338_v35 = vld [vmem:[%s2007_s7 + $0x8] sm:$0xff]  ;;  %v685_v46 = vld [vmem:[%s2004_s4] sm:$0xff]  ;;  %v1655_v53 = vld [vmem:[#allocation2 + $0x11] sm:$0xff]  ;;  %vm1137_vm13 = vcmask 261120  }
 0x268   : > { %v1337_v47 = vld [vmem:[%s2007_s7] sm:$0xff]  ;;  %v1651_v48 = vld [vmem:[%s2004_s4 + $0x8] sm:$0xff]  ;;  %v693_v49 = vperm.slane %v685_v46, 0  ;;  %v706_v50 = vperm.slane %v685_v46, 1  ;;  %1150 = vmatpush.bf16.msra.mxu0 %v1338_v35  ;;  %1341 = vmatpush.bf16.msra.mxu1 %v1338_v35  ;;  %v719_v54 = vperm.slane %v685_v46, 2  ;;  %v732_v55 = vperm.slane %v685_v46, 3 }
 0x269   : > { %v689_v51 = vld [vmem:[#allocation2 + $0x1] sm:$0xff]  ;;  %v1653_v52 = vld [vmem:[#allocation2 + $0x9] sm:$0xff]  ;;  %v745_v56 = vperm.slane %v685_v46, 4  ;;  %v1657_v57 = vld [vmem:[#allocation2 + $0x19] sm:$0xff]  ;;  %v1663_v63 = vperm.slane %v685_v46, 5  ;;  %v1671_v6 = vperm.slane %v685_v46, 6 }
 0x26a   : > { %v694_v58 = vmul.f32 %v693_v49, %v689_v51  ;;  %v695_v59 = vmul.f32 %v693_v49, %v1653_v52  ;;  %v696_v60 = vmul.f32 %v693_v49, %v1655_v53  ;;  %v702_v61 = vld [vmem:[#allocation2 + $0x2] sm:$0xff]  ;;  %v1661_v62 = vld [vmem:[#allocation2 + $0xa] sm:$0xff]  ;;  %v697_v0 = vmul.f32 %v693_v49, %v1657_v57  ;;  %v1666_v1 = vld [vmem:[#allocation2 + $0x12] sm:$0xff] }
 0x26b   : > { %v1668_v2 = vld [vmem:[#allocation2 + $0x1a] sm:$0xff]  ;;  %v707_v3 = vmul.f32 %v706_v50, %v702_v61  ;;  %v708_v4 = vmul.f32 %v706_v50, %v1661_v62  ;;  %v715_v5 = vld [vmem:[#allocation2 + $0x3] sm:$0xff]  ;;  %v709_v7 = vmul.f32 %v706_v50, %v1666_v1  ;;  %v1675_v9 = vld [vmem:[#allocation2 + $0xb] sm:$0xff]  ;;  %v1681_v13 = vperm.slane %v685_v46, 7 }
 0x26c   : > { %v710_v8 = vmul.f32 %v706_v50, %v1668_v2  ;;  %v1677_v10 = vld [vmem:[#allocation2 + $0x13] sm:$0xff]  ;;  %v1679_v11 = vld [vmem:[#allocation2 + $0x1b] sm:$0xff]  ;;  %v720_v12 = vmul.f32 %v719_v54, %v715_v5  ;;  %1151 = vmatpush.bf16.msra.mxu0 %v1337_v47  ;;  %1342 = vmatpush.bf16.msra.mxu1 %v1337_v47  ;;  %v721_v16 = vmul.f32 %v719_v54, %v1675_v9  ;;  %v728_v17 = vld [vmem:[#allocation2 + $0x4] sm:$0xff]  ;;  %v1689_v21 = vperm.slane %v1651_v48, 0 }
 0x26d   : > { %v711_v14 = vadd.f32 %v707_v3, %v694_v58  ;;  %v712_v15 = vadd.f32 %v708_v4, %v695_v59  ;;  %v1684_v18 = vld [vmem:[#allocation2 + $0xc] sm:$0xff]  ;;  %v1686_v19 = vld [vmem:[#allocation2 + $0x14] sm:$0xff]  ;;  %v713_v22 = vadd.f32 %v709_v7, %v696_v60  ;;  %v722_v20 = vmul.f32 %v719_v54, %v1677_v10  ;;  %v1693_v25 = vld [vmem:[#allocation2 + $0x1c] sm:$0xff] }
 0x26e   : > { %v714_v23 = vadd.f32 %v710_v8, %v697_v0  ;;  %v723_v24 = vmul.f32 %v719_v54, %v1679_v11  ;;  %v741_v26 = vld [vmem:[#allocation2 + $0x5] sm:$0xff]  ;;  %v1695_v27 = vld [vmem:[#allocation2 + $0xd] sm:$0xff]  ;;  %v733_v30 = vmul.f32 %v732_v55, %v728_v17  ;;  %v734_v34 = vmul.f32 %v732_v55, %v1684_v18  ;;  %v1698_v36 = vld [vmem:[#allocation2 + $0x15] sm:$0xff] }
 0x26f   : > { %v724_v28 = vadd.f32 %v720_v12, %v711_v14  ;;  %v725_v32 = vadd.f32 %v721_v16, %v712_v15  ;;  %v1700_v37 = vld [vmem:[#allocation2 + $0x1d] sm:$0xff]  ;;  %v726_v38 = vadd.f32 %v722_v20, %v713_v22  ;;  %v735_v40 = vmul.f32 %v732_v55, %v1686_v19  ;;  %v754_v41 = vld [vmem:[#allocation2 + $0x6] sm:$0xff]  ;;  %v1704_v42 = vld [vmem:[#allocation2 + $0xe] sm:$0xff] }
 0x270   : > { %v727_v39 = vadd.f32 %v723_v24, %v714_v23  ;;  %v736_v31 = vmul.f32 %v732_v55, %v1693_v25  ;;  %v746_v45 = vmul.f32 %v745_v56, %v741_v26  ;;  %v747_v29 = vmul.f32 %v745_v56, %v1695_v27  ;;  %v1707_v33 = vld [vmem:[#allocation2 + $0x16] sm:$0xff]  ;;  %v1709_v35 = vld [vmem:[#allocation2 + $0x1e] sm:$0xff]  ;;  %v767_v51 = vld [vmem:[#allocation2 + $0x7] sm:$0xff] }
 0x271   : > { %v737_v43 = vadd.f32 %v733_v30, %v724_v28  ;;  %v738_v44 = vadd.f32 %v734_v34, %v725_v32  ;;  %v739_v46 = vadd.f32 %v735_v40, %v726_v38  ;;  %v748_v49 = vmul.f32 %v745_v56, %v1698_v36  ;;  %v1713_v54 = vld [vmem:[#allocation2 + $0xf] sm:$0xff]  ;;  %v1718_v61 = vld [vmem:[#allocation2 + $0x17] sm:$0xff]  ;;  %v1720_v0 = vld [vmem:[#allocation2 + $0x1f] sm:$0xff] }
 0x272   : > { %v740_v47 = vadd.f32 %v736_v31, %v727_v39  ;;  %v749_v50 = vmul.f32 %v745_v56, %v1700_v37  ;;  %v759_v59 = vmul.f32 %v1663_v63, %v754_v41  ;;  %v760_v60 = vmul.f32 %v1663_v63, %v1704_v42  ;;  %v780_v7 = vld [vmem:[#allocation2 + $0x8] sm:$0xff]  ;;  %v1726_v8 = vld [vmem:[#allocation2 + $0x10] sm:$0xff]  ;;  %v1731_v17 = vld [vmem:[#allocation2 + $0x18] sm:$0xff] }
 0x273   : > { %v750_v55 = vadd.f32 %v746_v45, %v737_v43  ;;  %v751_v58 = vadd.f32 %v747_v29, %v738_v44  ;;  %v752_v3 = vadd.f32 %v748_v49, %v739_v46  ;;  %v761_v5 = vmul.f32 %v1663_v63, %v1707_v33  ;;  %v1733_v22 = vld [vmem:[#allocation2 + $0x20] sm:$0xff] }
 0x274   : > { %v753_v4 = vadd.f32 %v749_v50, %v740_v47  ;;  %v762_v56 = vmul.f32 %v1663_v63, %v1709_v35  ;;  %v772_v15 = vmul.f32 %v1671_v6, %v767_v51  ;;  %v773_v16 = vmul.f32 %v1671_v6, %v1713_v54  ;;  %v1742_v34 = vld [vmem:[#allocation2 + $0x21] sm:$0xff] }
 0x275   : > { %v763_v12 = vadd.f32 %v759_v59, %v750_v55  ;;  %v764_v14 = vadd.f32 %v760_v60, %v751_v58  ;;  %v765_v23 = vadd.f32 %v761_v5, %v752_v3  ;;  %v774_v24 = vmul.f32 %v1671_v6, %v1718_v61  ;;  %v1756_v49 = vld [vmem:[#allocation2 + $0x22] sm:$0xff] }
 0x276   : > { %v766_v20 = vadd.f32 %v762_v56, %v753_v4  ;;  %v775_v63 = vmul.f32 %v1671_v6, %v1720_v0  ;;  %v785_v32 = vmul.f32 %v1681_v13, %v780_v7  ;;  %v786_v30 = vmul.f32 %v1681_v13, %v1726_v8  ;;  %v1759_v55 = vld [vmem:[#allocation2 + $0x23] sm:$0xff] }
 0x277   : > { %v776_v26 = vadd.f32 %v772_v15, %v763_v12  ;;  %v777_v28 = vadd.f32 %v773_v16, %v764_v14  ;;  %v778_v38 = vadd.f32 %v774_v24, %v765_v23  ;;  %v787_v40 = vmul.f32 %v1681_v13, %v1731_v17  ;;  %v1768_v7 = vld [vmem:[#allocation2 + $0x24] sm:$0xff] }
 0x278   : > { %v779_v39 = vadd.f32 %v775_v63, %v766_v20  ;;  %v788_v31 = vmul.f32 %v1681_v13, %v1733_v22  ;;  %v795_v6 = vmul.f32 %v1689_v21, %v1653_v52  ;;  %v796_v44 = vmul.f32 %v1689_v21, %v1655_v53  ;;  %v1774_v63 = vld [vmem:[#allocation2 + $0x25] sm:$0xff] }
 0x279   : > { %v789_v41 = vadd.f32 %v785_v32, %v776_v26  ;;  %v790_v43 = vadd.f32 %v786_v30, %v777_v28  ;;  %v791_v45 = vadd.f32 %v787_v40, %v778_v38  ;;  %v797_v46 = vmul.f32 %v1689_v21, %v1657_v57 }
 0x27a   : > { %v792_v29 = vadd.f32 %v788_v31, %v779_v39  ;;  %v798_v47 = vmul.f32 %v1689_v21, %v1742_v34  ;;  %v804_v51 = vperm.slane %v1651_v48, 1  ;;  %v814_v52 = vperm.slane %v1651_v48, 2 }
 0x27b   : > { %v799_v50 = vadd.f32 %v795_v6, %v789_v41  ;;  %v800_v13 = vadd.f32 %v796_v44, %v790_v43  ;;  %v801_v58 = vadd.f32 %v797_v46, %v791_v45  ;;  %v824_v60 = vperm.slane %v1651_v48, 3  ;;  %v1784_v46 = vld [vmem:[#allocation2 + $0x26] sm:$0xff] }
 0x27c   : > { %v802_v59 = vadd.f32 %v798_v47, %v792_v29  ;;  %v834_v3 = vperm.slane %v1651_v48, 4  ;;  %v805_v4 = vmul.f32 %v804_v51, %v1661_v62  ;;  %v806_v21 = vmul.f32 %v804_v51, %v1666_v1  ;;  %v1789_v47 = vld [vmem:[%s2004_s4 + $0x10] sm:$0xff] }
 0x27d   : > { %v807_v5 = vmul.f32 %v804_v51, %v1668_v2  ;;  %v808_v56 = vmul.f32 %v804_v51, %v1756_v49  ;;  %v815_v12 = vmul.f32 %v814_v52, %v1675_v9  ;;  %v816_v14 = vmul.f32 %v814_v52, %v1677_v10 }
 0x27e   : > { %v817_v15 = vmul.f32 %v814_v52, %v1679_v11  ;;  %v818_v16 = vmul.f32 %v814_v52, %v1759_v55  ;;  %v809_v23 = vadd.f32 %v805_v4, %v799_v50  ;;  %v810_v20 = vadd.f32 %v806_v21, %v800_v13 }
 0x27f   : > { %v811_v24 = vadd.f32 %v807_v5, %v801_v58  ;;  %v812_v62 = vadd.f32 %v808_v56, %v802_v59  ;;  %v825_v26 = vmul.f32 %v824_v60, %v1684_v18  ;;  %v826_v28 = vmul.f32 %v824_v60, %v1686_v19 }
 0x280   : > { %v827_v32 = vmul.f32 %v824_v60, %v1693_v25  ;;  %v828_v9 = vmul.f32 %v824_v60, %v1768_v7  ;;  %v819_v30 = vadd.f32 %v815_v12, %v809_v23  ;;  %v820_v38 = vadd.f32 %v816_v14, %v810_v20  ;;  %v1794_v60 = vld [vmem:[#allocation2 + $0x27] sm:$0xff] }
 0x281   : > { %v821_v39 = vadd.f32 %v817_v15, %v811_v24  ;;  %v822_v40 = vadd.f32 %v818_v16, %v812_v62  ;;  %v835_v31 = vmul.f32 %v834_v3, %v1695_v27  ;;  %v836_v41 = vmul.f32 %v834_v3, %v1698_v36  ;;  %v1805_v24 = vld [vmem:[#allocation2 + $0x28] sm:$0xff] }
 0x282   : > { %v837_v43 = vmul.f32 %v834_v3, %v1700_v37  ;;  %v838_v6 = vmul.f32 %v834_v3, %v1774_v63  ;;  %v829_v44 = vadd.f32 %v825_v26, %v819_v30  ;;  %v830_v18 = vadd.f32 %v826_v28, %v820_v38 }
 0x283   : > { %v831_v45 = vadd.f32 %v827_v32, %v821_v39  ;;  %v832_v29 = vadd.f32 %v828_v9, %v822_v40  ;;  %v844_v50 = vperm.slane %v1651_v48, 5  ;;  %v854_v27 = vperm.slane %v1651_v48, 6 }
 0x284   : > { %v864_v13 = vperm.slane %v1651_v48, 7  ;;  %v839_v51 = vadd.f32 %v835_v31, %v829_v44  ;;  %v840_v52 = vadd.f32 %v836_v41, %v830_v18  ;;  %v874_v14 = vperm.slane %v1789_v47, 0 }
 0x285   : > { %v841_v58 = vadd.f32 %v837_v43, %v831_v45  ;;  %v842_v59 = vadd.f32 %v838_v6, %v832_v29  ;;  %v845_v3 = vmul.f32 %v844_v50, %v1704_v42  ;;  %v846_v4 = vmul.f32 %v844_v50, %v1707_v33 }
 0x286   : > { %v847_v21 = vmul.f32 %v844_v50, %v1709_v35  ;;  %v848_v5 = vmul.f32 %v844_v50, %v1784_v46  ;;  %v855_v56 = vmul.f32 %v854_v27, %v1713_v54  ;;  %v856_v12 = vmul.f32 %v854_v27, %v1718_v61 }
 0x287   : > { %v857_v48 = vmul.f32 %v854_v27, %v1720_v0  ;;  %v849_v15 = vadd.f32 %v845_v3, %v839_v51  ;;  %v850_v16 = vadd.f32 %v846_v4, %v840_v52  ;;  %v858_v20 = vmul.f32 %v854_v27, %v1794_v60 }
 0x288   : > { %v851_v23 = vadd.f32 %v847_v21, %v841_v58  ;;  %v852_v42 = vadd.f32 %v848_v5, %v842_v59  ;;  %v865_v62 = vmul.f32 %v864_v13, %v1726_v8  ;;  %v866_v26 = vmul.f32 %v864_v13, %v1731_v17 }
 0x289   : > { %v867_v54 = vmul.f32 %v864_v13, %v1733_v22  ;;  %v859_v28 = vadd.f32 %v855_v56, %v849_v15  ;;  %v860_v32 = vadd.f32 %v856_v12, %v850_v16  ;;  %v875_v30 = vmul.f32 %v874_v14, %v1655_v53  ;;  %v1853_v15 = vld [vmem:[#allocation2 + $0x29] sm:$0xff] }
 0x28a   : > { %v861_v9 = vadd.f32 %v857_v48, %v851_v23  ;;  %v876_v38 = vmul.f32 %v874_v14, %v1657_v57  ;;  %v877_v39 = vmul.f32 %v874_v14, %v1742_v34  ;;  %v868_v40 = vmul.f32 %v864_v13, %v1805_v24 }
 0x28b   : > { %v869_v31 = vadd.f32 %v865_v62, %v859_v28  ;;  %v870_v41 = vadd.f32 %v866_v26, %v860_v32  ;;  %v862_v6 = vadd.f32 %v858_v20, %v852_v42  ;;  %v1815_v8 = vperm.slane %v1789_v47, 1 }
 0x28c   : > { %v871_v43 = vadd.f32 %v867_v54, %v861_v9  ;;  %v1818_v44 = vperm.slane %v1789_v47, 2  ;;  %v1821_v18 = vperm.slane %v1789_v47, 3  ;;  %v1824_v50 = vperm.slane %v1789_v47, 4  ;;  %v688_v54 = vld [vmem:[%s2004_s4 + $0x18] sm:$0x7f] }
 0x28d   : > { %v879_v53 = vadd.f32 %v875_v30, %v869_v31  ;;  %v880_v45 = vadd.f32 %v876_v38, %v870_v41  ;;  %v885_v27 = vmul.f32 %v1815_v8, %v1666_v1  ;;  %v886_v13 = vmul.f32 %v1815_v8, %v1668_v2 }
 0x28e   : > { %v881_v29 = vadd.f32 %v877_v39, %v871_v43  ;;  %v887_v51 = vmul.f32 %v1815_v8, %v1756_v49  ;;  %v895_v52 = vmul.f32 %v1818_v44, %v1677_v10  ;;  %v896_v58 = vmul.f32 %v1818_v44, %v1679_v11 }
 0x28f   : > { %v897_v59 = vmul.f32 %v1818_v44, %v1759_v55  ;;  %v905_v3 = vmul.f32 %v1821_v18, %v1686_v19  ;;  %v906_v1 = vmul.f32 %v1821_v18, %v1693_v25  ;;  %v889_v4 = vadd.f32 %v885_v27, %v879_v53 }
 0x290   : > { %v890_v21 = vadd.f32 %v886_v13, %v880_v45  ;;  %v891_v5 = vadd.f32 %v887_v51, %v881_v29  ;;  %v907_v56 = vmul.f32 %v1821_v18, %v1768_v7  ;;  %v915_v10 = vmul.f32 %v1824_v50, %v1698_v36 }
 0x291   : > { %v916_v12 = vmul.f32 %v1824_v50, %v1700_v37  ;;  %v917_v48 = vmul.f32 %v1824_v50, %v1774_v63  ;;  %v1851_v19 = vperm.slane %v1789_v47, 5  ;;  %v899_v16 = vadd.f32 %v895_v52, %v889_v4 }
 0x292   : > { %v900_v23 = vadd.f32 %v896_v58, %v890_v21  ;;  %v901_v20 = vadd.f32 %v897_v59, %v891_v5  ;;  %v1856_v42 = vperm.slane %v1789_v47, 6  ;;  %v1863_v26 = vperm.slane %v1789_v47, 7  ;;  %v893_v5 = vld [vmem:[#allocation2 + $0x2b] sm:$0xff] }
 0x293   : > { %v925_v36 = vmul.f32 %v1851_v19, %v1707_v33  ;;  %v926_v62 = vmul.f32 %v1851_v19, %v1709_v35  ;;  %v909_v28 = vadd.f32 %v905_v3, %v899_v16  ;;  %v927_v30 = vmul.f32 %v1851_v19, %v1784_v46 }
 0x294   : > { %v910_v32 = vadd.f32 %v906_v1, %v900_v23  ;;  %v911_v9 = vadd.f32 %v907_v56, %v901_v20  ;;  %v872_v38 = vadd.f32 %v868_v40, %v862_v6  ;;  %v878_v39 = vmul.f32 %v874_v14, %v1853_v15 }
 0x295   : > { %v935_v33 = vmul.f32 %v1856_v42, %v1718_v61  ;;  %v919_v31 = vadd.f32 %v915_v10, %v909_v28  ;;  %v936_v43 = vmul.f32 %v1856_v42, %v1720_v0  ;;  %v937_v53 = vmul.f32 %v1856_v42, %v1794_v60 }
 0x296   : > { %v920_v41 = vadd.f32 %v916_v12, %v910_v32  ;;  %v921_v47 = vadd.f32 %v917_v48, %v911_v9  ;;  %v945_v45 = vmul.f32 %v1863_v26, %v1731_v17  ;;  %v946_v40 = vmul.f32 %v1863_v26, %v1733_v22  ;;  %v883_v22 = vld [vmem:[#allocation2 + $0x2a] sm:$0xff] }
 0x297   : > { %v1881_v6 = vperm.slane %v688_v54, 0  ;;  %v929_v14 = vadd.f32 %v925_v36, %v919_v31  ;;  %v1883_v27 = vperm.slane %v688_v54, 1  ;;  %v1885_v13 = vperm.slane %v688_v54, 2 }
 0x298   : > { %v930_v29 = vadd.f32 %v926_v62, %v920_v41  ;;  %v931_v61 = vadd.f32 %v927_v30, %v921_v47  ;;  %v1887_v51 = vperm.slane %v688_v54, 3  ;;  %v882_v3 = vadd.f32 %v878_v39, %v872_v38  ;;  %v923_v39 = vld [vmem:[#allocation2 + $0x2e] sm:$0xff] }
 0x299   : > { %v939_v52 = vadd.f32 %v935_v33, %v929_v14  ;;  %v955_v59 = vmul.f32 %v1881_v6, %v1657_v57  ;;  %v956_v17 = vmul.f32 %v1881_v6, %v1742_v34  ;;  %v947_v4 = vmul.f32 %v1863_v26, %v1805_v24  ;;  %v903_v24 = vld [vmem:[#allocation2 + $0x2c] sm:$0xff] }
 0x29a   : > { %v940_v58 = vadd.f32 %v936_v43, %v930_v29  ;;  %v941_v1 = vadd.f32 %v937_v53, %v931_v61  ;;  %v1895_v21 = vperm.slane %v688_v54, 4  ;;  %v965_v12 = vmul.f32 %v1883_v27, %v1668_v2  ;;  %v913_v2 = vld [vmem:[#allocation2 + $0x2d] sm:$0xff] }
 0x29b   : > { %v949_v56 = vadd.f32 %v945_v45, %v939_v52  ;;  %v966_v57 = vmul.f32 %v1883_v27, %v1756_v49  ;;  %v975_v34 = vmul.f32 %v1885_v13, %v1679_v11  ;;  %v976_v48 = vmul.f32 %v1885_v13, %v1759_v55  ;;  %v943_v29 = vld [vmem:[#allocation2 + $0x30] sm:$0xff] }
 0x29c   : > { %v950_v10 = vadd.f32 %v946_v40, %v940_v58  ;;  %v888_v16 = vmul.f32 %v1815_v8, %v883_v22  ;;  %v985_v36 = vmul.f32 %v1887_v51, %v1693_v25  ;;  %v898_v62 = vmul.f32 %v1818_v44, %v893_v5 }
 0x29d   : > { %v959_v23 = vadd.f32 %v955_v59, %v949_v56  ;;  %v951_v28 = vadd.f32 %v947_v4, %v941_v1  ;;  %v986_v49 = vmul.f32 %v1887_v51, %v1768_v7  ;;  %v995_v11 = vmul.f32 %v1895_v21, %v1700_v37 }
 0x29e   : > { %v960_v20 = vadd.f32 %v956_v17, %v950_v10  ;;  %v1913_v32 = vperm.slane %v688_v54, 5  ;;  %v892_v9 = vadd.f32 %v888_v16, %v882_v3  ;;  %v908_v30 = vmul.f32 %v1821_v18, %v903_v24  ;;  %v953_v17 = vld [vmem:[#allocation2 + $0x31] sm:$0xff] }
 0x29f   : > { %v969_v55 = vadd.f32 %v965_v12, %v959_v23  ;;  %v996_v25 = vmul.f32 %v1895_v21, %v1774_v63  ;;  %v1918_v38 = vperm.slane %v688_v54, 6  ;;  %v918_v44 = vmul.f32 %v1824_v50, %v913_v2  ;;  %v933_v63 = vld [vmem:[#allocation2 + $0x2f] sm:$0xff] }
 0x2a0   : > { %v970_v8 = vadd.f32 %v966_v57, %v960_v20  ;;  %v957_v7 = vmul.f32 %v1881_v6, %v1853_v15  ;;  %v902_v31 = vadd.f32 %v898_v62, %v892_v9  ;;  %v967_v41 = vmul.f32 %v1883_v27, %v883_v22  ;;  %v973_v16 = vld [vmem:[#allocation2 + $0x33] sm:$0xff] }
 0x2a1   : > { %v979_v33 = vadd.f32 %v975_v34, %v969_v55  ;;  %v1005_v47 = vmul.f32 %v1913_v32, %v1709_v35  ;;  %v1006_v18 = vmul.f32 %v1913_v32, %v1784_v46  ;;  %v977_v43 = vmul.f32 %v1885_v13, %v893_v5  ;;  %v963_v5 = vld [vmem:[#allocation2 + $0x32] sm:$0xff] }
 0x2a2   : > { %v980_v37 = vadd.f32 %v976_v48, %v970_v8  ;;  %v961_v54 = vadd.f32 %v957_v7, %v951_v28  ;;  %v912_v45 = vadd.f32 %v908_v30, %v902_v31  ;;  %v928_v15 = vmul.f32 %v1851_v19, %v923_v39  ;;  %v993_v9 = vld [vmem:[#allocation2 + $0x35] sm:$0xff] }
 0x2a3   : > { %v989_v50 = vadd.f32 %v985_v36, %v979_v33  ;;  %v1015_v40 = vmul.f32 %v1918_v38, %v1720_v0  ;;  %v1016_v14 = vmul.f32 %v1918_v38, %v1794_v60  ;;  %v987_v61 = vmul.f32 %v1887_v51, %v903_v24  ;;  %v1416_v0 = vld [vmem:[%s2005_s5] ss:$0 sm:$0xff]  ;;  %v1003_v7 = vld [vmem:[#allocation2 + $0x36] sm:$0xff] }
 0x2a4   : > { %v990_v53 = vadd.f32 %v986_v49, %v980_v37  ;;  %v971_v35 = vadd.f32 %v967_v41, %v961_v54  ;;  %v922_v58 = vadd.f32 %v918_v44, %v912_v45  ;;  %v938_v59 = vmul.f32 %v1856_v42, %v933_v63  ;;  %v1417_v42 = vld [vmem:[%s2006_s6] ss:$0 sm:$0xff]  ;;  %v1013_v31 = vld [vmem:[#allocation2 + $0x37] sm:$0xff] }
 0x2a5   : > { %v999_v46 = vadd.f32 %v995_v11, %v989_v50  ;;  %v997_v3 = vmul.f32 %v1895_v21, %v913_v2  ;;  %v948_v4 = vmul.f32 %v1863_v26, %v943_v29  ;;  %v1007_v10 = vmul.f32 %v1913_v32, %v923_v39  ;;  %v983_v2 = vld [vmem:[#allocation2 + $0x34] sm:$0xff] }
 0x2a6   : > { %v1000_v52 = vadd.f32 %v996_v25, %v990_v53  ;;  %v981_v22 = vadd.f32 %v977_v43, %v971_v35  ;;  %v932_v60 = vadd.f32 %v928_v15, %v922_v58  ;;  %v958_v48 = vmul.f32 %v1881_v6, %v953_v17 }
 0x2a7   : > { %v1009_v19 = vadd.f32 %v1005_v47, %v999_v46  ;;  %v1017_v23 = vmul.f32 %v1918_v38, %v933_v63  ;;  %v968_v62 = vmul.f32 %v1883_v27, %v963_v5  ;;  %v978_v8 = vmul.f32 %v1885_v13, %v973_v16 }
 0x2a8   : > { %v1010_v1 = vadd.f32 %v1006_v18, %v1000_v52  ;;  %v991_v56 = vadd.f32 %v987_v61, %v981_v22  ;;  %v942_v34 = vadd.f32 %v938_v59, %v932_v60  ;;  %v988_v39 = vmul.f32 %v1887_v51, %v983_v2 }
 0x2a9   : > { %v1019_v12 = vadd.f32 %v1015_v40, %v1009_v19  ;;  %v998_v37 = vmul.f32 %v1895_v21, %v993_v9  ;;  %v1008_v47 = vmul.f32 %v1913_v32, %v1003_v7  ;;  %v1018_v54 = vmul.f32 %v1918_v38, %v1013_v31 }
 0x2aa   : > { %v1020_v57 = vadd.f32 %v1016_v14, %v1010_v1  ;;  %v1001_v24 = vadd.f32 %v997_v3, %v991_v56  ;;  %v952_v26 = vadd.f32 %v948_v4, %v942_v34 }
 0x2ab   : > { %v1027_v20 = vmul.f32 %v1416_v0, %v1019_v12 }
 0x2ac   : > { %v1028_v36 = vmul.f32 %v1416_v0, %v1020_v57  ;;  %v1011_v28 = vadd.f32 %v1007_v10, %v1001_v24  ;;  %v962_v55 = vadd.f32 %v958_v48, %v952_v26 }
 0x2ad   : > { %v1948_v49 = vadd.f32 %v1417_v42, %v1027_v20 }
 0x2ae   : > { %v1950_v11 = vadd.f32 %v1417_v42, %v1028_v36  ;;  %v1021_v6 = vadd.f32 %v1017_v23, %v1011_v28  ;;  %v972_v44 = vadd.f32 %v968_v62, %v962_v55 }
 0x2af   : > { %v1318_v30 = vmul.f32 -1.442695, %v1948_v49 }
 0x2b0   : > { %v1319_v25 = vmul.f32 -1.442695, %v1950_v11  ;;  %v1029_v27 = vmul.f32 %v1416_v0, %v1021_v6  ;;  %v982_v33 = vadd.f32 %v978_v8, %v972_v44 }
 0x2b1   : > { %1418 = vpow2.f32 %v1318_v30 }
 0x2b2   : > { %1420 = vpow2.f32 %v1319_v25  ;;  %v1957_v41 = vadd.f32 %v1417_v42, %v1029_v27  ;;  %v992_v13 = vadd.f32 %v988_v39, %v982_v33 }
 0x2b4   : > { %v1320_v18 = vmul.f32 -1.442695, %v1957_v41  ;;  %v1002_v63 = vadd.f32 %v998_v37, %v992_v13 }
 0x2b6   : > { %1422 = vpow2.f32 %v1320_v18  ;;  %v1012_v43 = vadd.f32 %v1008_v47, %v1002_v63 }
 0x2b7   : > { %v1419_v51 = vpop.eup %1418 }
 0x2b8   : > { %v1421_v50 = vpop.eup %1420  ;;  %v1051_v53 = vadd.f32 1.0, %v1419_v51  ;;  %v1022_v15 = vadd.f32 %v1018_v54, %v1012_v43 }
 0x2b9   : > { %v1052_v45 = vadd.f32 1.0, %v1421_v50 }
 0x2ba   : > { %1424 = vrcp.f32 %v1051_v53  ;;  %v1030_v40 = vmul.f32 %v1416_v0, %v1022_v15  ;;  %vm1060_vm0 = vweird.f32 %v1051_v53  ;;  %v1066_v46 = vand.u32 2147483648, %v1051_v53 }
 0x2bb   : > { %1426 = vrcp.f32 %v1052_v45  ;;  %v1064_v59 = vand.u32 2147483647, %v1051_v53  ;;  %v1081_v17 = vand.u32 2147483648, %v1052_v45  ;;  %vm1075_vm7 = vweird.f32 %v1052_v45 }
 0x2bc   : > { %v1423_v21 = vpop.eup %1422  ;;  %v1962_v29 = vadd.f32 %v1417_v42, %v1030_v40  ;;  %v1079_v3 = vand.u32 2147483647, %v1052_v45  ;;  %v1067_v0 = vor.u32 1.1754944e-38, %v1066_v46 }
 0x2bd   : > { %v1053_v14 = vadd.f32 1.0, %v1423_v21  ;;  %vm1065_vm10 = vcmp.eq.f32.partialorder %v1064_v59, 8.507059e+37  ;;  %v1082_v56 = vor.u32 1.1754944e-38, %v1081_v17 }
 0x2be   : > { %v1321_v35 = vmul.f32 -1.442695, %v1962_v29  ;;  %vm1080_vm12 = vcmp.eq.f32.partialorder %v1079_v3, 8.507059e+37 }
 0x2bf   : > { %1428 = vrcp.f32 %v1053_v14  ;;  %vm1090_vm14 = vweird.f32 %v1053_v14  ;;  %v1094_v62 = vand.u32 2147483647, %v1053_v14  ;;  %v1096_v2 = vand.u32 2147483648, %v1053_v14 }
 0x2c0   : > { %v1425_v32 = vpop.eup %1424  ;;  %1430 = vpow2.f32 %v1321_v35 }
 0x2c1   : > { %v1427_v61 = vpop.eup %1426  ;;  %v1056_v38 = vmul.f32 %v1425_v32, %v1051_v53  ;;  %vm1061_vm6 = vweird.f32 %v1425_v32  ;;  %vm1095_vm2 = vcmp.eq.f32.partialorder %v1094_v62, 8.507059e+37  ;;  %v1097_v9 = vor.u32 1.1754944e-38, %v1096_v2 }
 0x2c2   : > { %v1071_v52 = vmul.f32 %v1427_v61, %v1052_v45  ;;  %vm1076_vm8 = vweird.f32 %v1427_v61  ;;  %vm1062_vm9 = vmor %vm1060_vm0, %vm1061_vm6 }
 0x2c3   : > { %v1057_v58 = vsub.f32 1.0, %v1056_v38  ;;  %vm1077_vm11 = vmor %vm1075_vm7, %vm1076_vm8 }
 0x2c4   : > { %v1072_v22 = vsub.f32 1.0, %v1071_v52 }
 0x2c5   : > { %v1429_v19 = vpop.eup %1428  ;;  %v1058_v1 = vmul.f32 %v1425_v32, %v1057_v58 }
 0x2c6   : > { %v1073_v60 = vmul.f32 %v1427_v61, %v1072_v22  ;;  %v1086_v4 = vmul.f32 %v1429_v19, %v1053_v14  ;;  %v1431_v10 = vpop.eup %1430  ;;  %vm1091_vm15 = vweird.f32 %v1429_v19 }
 0x2c7   : > { %v1059_v5 = vadd.f32 %v1425_v32, %v1058_v1  ;;  %v1054_v34 = vadd.f32 1.0, %v1431_v10  ;;  %vm1092_vm1 = vmor %vm1090_vm14, %vm1091_vm15 }
 0x2c8   : > { %v1074_v12 = vadd.f32 %v1427_v61, %v1073_v60  ;;  %v1087_v57 = vsub.f32 1.0, %v1086_v4 }
 0x2c9   : > { %v1063_v42 = vsel %vm1062_vm9, %v1425_v32, %v1059_v5  ;;  %1432 = vrcp.f32 %v1054_v34  ;;  %vm1105_vm3 = vweird.f32 %v1054_v34 }
 0x2ca   : > { %v1068_v48 = vsel %vm1065_vm10, %v1067_v0, %v1063_v42  ;;  %v1078_v16 = vsel %vm1077_vm11, %v1427_v61, %v1074_v12  ;;  %v1088_v36 = vmul.f32 %v1429_v19, %v1087_v57 }
 0x2cb   : > { %v1083_v24 = vsel %vm1080_vm12, %v1082_v56, %v1078_v16  ;;  %v1115_v23 = vmul.f32 %v1068_v48, %v1948_v49  ;;  %v1111_v49 = vand.u32 2147483648, %v1054_v34 }
 0x2cc   : > { %v1116_v20 = vmul.f32 %v1083_v24, %v1950_v11  ;;  %v1089_v28 = vadd.f32 %v1429_v19, %v1088_v36  ;;  %v1109_v11 = vand.u32 2147483647, %v1054_v34 }
 0x2cd   : > { %v1112_v39 = vor.u32 1.1754944e-38, %v1111_v49 }
 0x2ce   : > { %v1119_v26 = vpack.c.bf16 %v1116_v20, %v1115_v23  ;;  %v1093_v6 = vsel %vm1092_vm1, %v1429_v19, %v1089_v28  ;;  %vm1110_vm0 = vcmp.eq.f32.partialorder %v1109_v11, 8.507059e+37 }
 0x2cf   : > { %v1433_v55 = vpop.eup %1432  ;;  %v1098_v44 = vsel %vm1095_vm2, %v1097_v9, %v1093_v6 }
 0x2d0   : > { %1330 = vmatmul.msk.bf16.vlgmr.msra.gmra.mxu0 %vm1137_vm13, %v1119_v26  ;;  %v1101_v8 = vmul.f32 %v1433_v55, %v1054_v34  ;;  %vm1106_vm4 = vweird.f32 %v1433_v55  ;;  %v1117_v33 = vmul.f32 %v1098_v44, %v1957_v41 }
 0x2d1   : > { %vm1107_vm5 = vmor %vm1105_vm3, %vm1106_vm4 }
 0x2d2   : > { %v1102_v30 = vsub.f32 1.0, %v1101_v8 }
 0x2d4   : > { %v1103_v25 = vmul.f32 %v1433_v55, %v1102_v30 }
 0x2d6   : > { %v1104_v7 = vadd.f32 %v1433_v55, %v1103_v25 }
 0x2d8   : > { %v1108_v27 = vsel %vm1107_vm5, %v1433_v55, %v1104_v7 }
 0x2d9   : > { %v1113_v37 = vsel %vm1110_vm0, %v1112_v39, %v1108_v27 }
 0x2da   : > { %v1118_v31 = vmul.f32 %v1113_v37, %v1962_v29 }
 0x2dc   : > { %v1120_v13 = vpack.c.bf16 %v1118_v31, %v1117_v33 }
 0x2de   : > { %1331 = vmatmul.msk.bf16.vlgmr.msra.gmra.mxu1 %vm1137_vm13, %v1120_v13 }
 0x34d   : > { %v1153_v47 = vpop.f32.mrf.mxu0 }
 0x34e   : > { %1163 = vst.msk [vmem:[%s1565_s26] sm:$0xff] %vm1137_vm13, %v1153_v47 }
 0x355   : > { %v1155_v18 = vpop.f32.mrf.mxu0 }
 0x356   : > { %1164 = vst.msk [vmem:[%s1565_s26 + $0x8] sm:$0xff] %vm1137_vm13, %v1155_v18 }
 0x35b   : > { %v1158_v63 = vpop.f32.mrf.mxu1 }
 0x35c   : > { %1165 = vst.msk [vmem:[%s1565_s26 + $0x10] sm:$0xff] %vm1137_vm13, %v1158_v63 }
 0x363   : > { %v1160_v54 = vpop.f32.mrf.mxu1 }
 0x364   : > { %1166 = vst.msk [vmem:[%s1565_s26 + $0x18] sm:$0xff] %vm1137_vm13, %v1160_v54 }
 0x365 PF: > { %p1167_p2 = pnand %p681_p0, %p375_p7 }
 0x367   : > { %1170 = sbr.rel (%p1167_p2) target bundleno = 879 (0x36f), region = 72 }
 0x36c   : > { %v1171_v41 = vld [vmem:[#allocation2 + $0x20] sm:$0xff]  ;;  %vm1173_vm6 = vcmask 261120   ;;  %v1172_v51 = vld [vmem:[#allocation2 + $0x28] sm:$0xff] }
 0x36d   : > { %1174 = vst.msk [vmem:[#allocation2] sm:$0xff] %vm1173_vm6, %v1171_v41 }
 0x36e   : > { %1175 = vst.msk [vmem:[#allocation2 + $0x8] sm:$0xff] %vm1173_vm6, %v1172_v51 }
 0x36f PF: > { %1178 = sbr.rel (%p1299_p11) target bundleno = 889 (0x379), region = 76 }
 0x374   : > { %v1179_v43 = vld [vmem:[#allocation3] sm:$0xff]  ;;  %vm1183_vm7 = vcmask 261120   ;;  %v1180_v50 = vld [vmem:[#allocation3 + $0x8] sm:$0xff]  ;;  %v1181_v53 = vld [vmem:[#allocation3 + $0x10] sm:$0xff] }
 0x375   : > { %1184 = vst.msk [vmem:[#allocation2 + $0x10] sm:$0xff] %vm1183_vm7, %v1179_v43  ;;  %v1182_v45 = vld [vmem:[#allocation3 + $0x18] sm:$0xff] }
 0x376   : > { %1185 = vst.msk [vmem:[#allocation2 + $0x18] sm:$0xff] %vm1183_vm7, %v1180_v50 }
 0x377   : > { %1186 = vst.msk [vmem:[#allocation2 + $0x20] sm:$0xff] %vm1183_vm7, %v1181_v53 }
 0x378   : > { %1187 = vst.msk [vmem:[#allocation2 + $0x28] sm:$0xff] %vm1183_vm7, %v1182_v45 }
 0x379 PF: > { %s18_s9 = sadd.s32 1, %s1472_s9   ;;  %s2009_s27 = smov %s1464_s29 }
 0x37a   : > { %p15_p3 = scmp.ge.s32.totalorder %s18_s9, 10   ;;  %s2010_s28 = smov %s1468_s30 }
 0x37b   : > { %s2011_s29 = smov %s2014_s10  ;;  %s2012_s30 = smov %s2018_s11 }
 0x37c   :  { %17 = sbr.rel (!%p15_p3) target bundleno = 3 (0x3), region = 106 }

</bundles_post_ra>
